<compile_context>
chip_gen: v6e
topology: v6e:2x2x1
jax: 0.10.0
libtpu: 0.0.40
codegen_flags: <defaults>
</compile_context>

<pallas_src>
import functools
import math

import jax
import jax.numpy as jnp
from jax.experimental import pallas as pl
from jax.experimental.pallas import tpu as pltpu


def _round_up(x, m):
    return (x + m - 1) // m * m


def _tpu_flavor():
    kind = ""
    try:
        kind = jax.devices()[0].device_kind.lower()
    except Exception:
        pass
    if ("v5 lite" in kind) or ("v5e" in kind) or ("v5lite" in kind):
        return "v5e"
    if "v7" in kind:
        return "v7x"
    return "v6e"          # v6e / v5p / unknown -> 256-wide MXU path


def _mxu_tile():
    return 128 if _tpu_flavor() == "v5e" else 256


def _default_tq():
    # v5e: 128-row LHS tiles match the 4x128^2 MXU; v6e/v7x: 256-row tiles.
    return 128 if _tpu_flavor() == "v5e" else 256


def _vmem_limit_bytes():
    # v7x has 64 MiB VMEM per TensorCore; v5e/v6e have 128 MiB.
    return (56 if _tpu_flavor() == "v7x" else 100) * 1024 * 1024


# --------------- capability probe: single-buffered (invariant) inputs ---------

_BUFFERED_ONE = None


def _single_buffer_supported():
    """Probe whether BlockSpec(pipeline_mode=pl.Buffered(1)) lowers on this JAX/TPU.

    Grid-invariant weights only need one VMEM buffer; if the knob is unavailable
    we silently fall back to the default (double-buffered) behaviour.
    """
    global _BUFFERED_ONE
    if _BUFFERED_ONE is not None:
        return _BUFFERED_ONE
    if not hasattr(pl, "Buffered"):
        _BUFFERED_ONE = False
        return False
    try:
        def _probe(x_ref, o_ref):
            o_ref[...] = x_ref[...] + 1.0

        out = pl.pallas_call(
            _probe,
            out_shape=jax.ShapeDtypeStruct((8, 128), jnp.float32),
            grid=(2,),
            in_specs=[pl.BlockSpec((8, 128), lambda i: (0, 0),
                                   pipeline_mode=pl.Buffered(1))],
            out_specs=pl.BlockSpec((8, 128), lambda i: (0, 0)),
        )(jnp.zeros((8, 128), jnp.float32))
        jax.block_until_ready(out)
        _BUFFERED_ONE = True
    except Exception:
        _BUFFERED_ONE = False
    return _BUFFERED_ONE


# ----------------------------- tiled matmul ---------------------------------

def _matmul_kernel(a_ref, b_ref, o_ref):
    @pl.when(pl.program_id(2) == 0)
    def _():
        o_ref[...] = jnp.zeros_like(o_ref)

    # Accumulate directly into the VMEM-resident f32 output block.
    o_ref[...] += jnp.dot(a_ref[...], b_ref[...],
                          preferred_element_type=jnp.float32)


def pallas_matmul(a, b):
    """a (M,K) @ b (K,N) -> (M,N) f32.  bf16 MXU inputs, f32 accumulation."""
    M, K = a.shape
    K2, N = b.shape
    assert K == K2
    t = _mxu_tile()
    tm = min(t, _round_up(M, 16))
    tn = min(2 * t, _round_up(N, 128))       # up to 512-wide output tiles
    tk = min(4 * t, _round_up(K, 128))       # up to 1024-deep K tiles (bf16)
    Mp, Kp, Np = _round_up(M, tm), _round_up(K, tk), _round_up(N, tn)
    a_p = jnp.pad(a.astype(jnp.bfloat16), ((0, Mp - M), (0, Kp - K)))
    b_p = jnp.pad(b.astype(jnp.bfloat16), ((0, Kp - K), (0, Np - N)))
    out = pl.pallas_call(
        _matmul_kernel,
        out_shape=jax.ShapeDtypeStruct((Mp, Np), jnp.float32),
        grid=(Mp // tm, Np // tn, Kp // tk),
        in_specs=[pl.BlockSpec((tm, tk), lambda i, j, k: (i, k)),
                  pl.BlockSpec((tk, tn), lambda i, j, k: (k, j))],
        out_specs=pl.BlockSpec((tm, tn), lambda i, j, k: (i, j)),
        compiler_params=pltpu.CompilerParams(
            dimension_semantics=("parallel", "parallel", "arbitrary"),
            vmem_limit_bytes=_vmem_limit_bytes()),
    )(a_p, b_p)
    return out[:M, :N]


# ------------------------- row-tiled layernorm -------------------------------

def _layernorm_kernel(x_ref, g_ref, b_ref, o_ref):
    x = x_ref[...]
    m = jnp.mean(x, axis=-1, keepdims=True)
    v = jnp.mean(jnp.square(x - m), axis=-1, keepdims=True)
    o_ref[...] = (x - m) * jax.lax.rsqrt(v + 1e-5) * g_ref[...] + b_ref[...]


def pallas_layernorm(x, g, b, *, block_rows=256):
    shape = x.shape
    C = shape[-1]
    R = math.prod(shape[:-1])
    xf = x.reshape(R, C)
    tr = min(block_rows, _round_up(R, 8))
    Rp = _round_up(R, tr)
    xf = jnp.pad(xf, ((0, Rp - R), (0, 0)))
    out = pl.pallas_call(
        _layernorm_kernel,
        out_shape=jax.ShapeDtypeStruct((Rp, C), jnp.float32),
        grid=(Rp // tr,),
        in_specs=[pl.BlockSpec((tr, C), lambda i: (i, 0)),
                  pl.BlockSpec((1, C), lambda i: (0, 0)),
                  pl.BlockSpec((1, C), lambda i: (0, 0))],
        out_specs=pl.BlockSpec((tr, C), lambda i: (i, 0)),
        compiler_params=pltpu.CompilerParams(
            dimension_semantics=("parallel",)),
    )(xf, g, b)
    return out[:R].reshape(shape)


# --------------------- fused residual attention block ------------------------

def _block_kernel(x_ref, ln1_g, ln1_b, wqkv, bqkv, wo, bo, ln2_g, ln2_b,
                  wfc, bfc, wpr, bpr, o_ref, q_s, k_s, v_s,
                  *, n_head, seq_len, tq):
    """One ResidualAttentionBlock for one (batch, query-tile) grid step.

    At q == 0 the full-sequence LN1 + QKV projection are computed once per
    batch into bf16 VMEM scratch and reused by every subsequent query tile.
    """
    f32, bf16 = jnp.float32, jnp.bfloat16
    Lp, C = k_s.shape
    hd = C // n_head
    scale = 1.0 / math.sqrt(hd)
    qi = pl.program_id(1)

    def ln(t, g, b):
        m = jnp.mean(t, axis=-1, keepdims=True)
        var = jnp.mean(jnp.square(t - m), axis=-1, keepdims=True)
        return (t - m) * jax.lax.rsqrt(var + 1e-5) * g + b

    # ---- once per (layer, batch): LN1 + QKV over the whole sequence ----
    @pl.when(qi == 0)
    def _():
        yf = ln(x_ref[0], ln1_g[...], ln1_b[...]).astype(bf16)        # (Lp, C)
        qkv = jnp.dot(yf, wqkv[...],
                      preferred_element_type=f32) + bqkv[...]         # (Lp, 3C)
        q_s[...] = qkv[:, :C].astype(bf16)
        k_s[...] = qkv[:, C:2 * C].astype(bf16)
        v_s[...] = qkv[:, 2 * C:].astype(bf16)

    # ---- per query tile ----
    start = pl.multiple_of(qi * tq, tq)
    x_b = x_ref.at[0]                                                 # (Lp, C) view
    xq = x_b[pl.ds(start, tq), :]                                     # residual base, f32
    q = q_s[pl.ds(start, tq), :]                                      # (tq, C) bf16

    qh = q.reshape(tq, n_head, hd)
    kh = k_s[...].reshape(Lp, n_head, hd)
    vh = v_s[...].reshape(Lp, n_head, hd)
    s = jnp.einsum('qhd,khd->hqk', qh, kh,
                   preferred_element_type=f32) * scale                # (H, tq, Lp)
    if seq_len < Lp:                                                  # mask padded keys
        key_idx = jax.lax.broadcasted_iota(jnp.int32, (1, 1, Lp), 2)
        s = s + jnp.where(key_idx < seq_len, 0.0, -1e30).astype(f32)
    s = s - jnp.max(s, axis=-1, keepdims=True)
    p = jnp.exp(s)
    p = p * pl.reciprocal(jnp.sum(p, axis=-1, keepdims=True), approx=True)
    o = jnp.einsum('hqk,khd->qhd', p.astype(bf16), vh,
                   preferred_element_type=f32)                        # (tq, H, hd)
    att = jnp.dot(o.reshape(tq, C).astype(bf16), wo[...],
                  preferred_element_type=f32) + bo[...]
    x1 = xq + att                                                     # residual 1

    # ---- MLP with QuickGELU (pre-LN) ----
    y2 = ln(x1, ln2_g[...], ln2_b[...])
    h1 = jnp.dot(y2.astype(bf16), wfc[...],
                 preferred_element_type=f32) + bfc[...]               # (tq, 4C)
    h1 = h1 * jax.nn.sigmoid(1.702 * h1)                              # QuickGELU (f32 VPU)
    h2 = jnp.dot(h1.astype(bf16), wpr[...],
                 preferred_element_type=f32) + bpr[...]               # (tq, C)
    o_ref[0] = x1 + h2                                                # residual 2


_BLOCK_WEIGHT_KEYS = ('ln1_g', 'ln1_b', 'wqkv', 'bqkv', 'wo', 'bo',
                      'ln2_g', 'ln2_b', 'wfc', 'bfc', 'wpr', 'bpr')


def _invariant_spec(shape, single_buffer):
    """BlockSpec for a grid-invariant (weight) input; single-buffered if possible."""
    nd = len(shape)
    if single_buffer:
        return pl.BlockSpec(shape, lambda b, q, _n=nd: (0,) * _n,
                            pipeline_mode=pl.Buffered(1))
    return pl.BlockSpec(shape, lambda b, q, _n=nd: (0,) * _n)


def pallas_block(x, blk, *, n_head, seq_len, tq):
    """x: (B, Lp, C) f32 with Lp a multiple of tq.  Returns (B, Lp, C)."""
    B, Lp, C = x.shape
    assert Lp % tq == 0 and seq_len >= 1
    weights = [blk[k] for k in _BLOCK_WEIGHT_KEYS]
    sb = _single_buffer_supported()

    return pl.pallas_call(
        functools.partial(_block_kernel, n_head=n_head, seq_len=seq_len, tq=tq),
        out_shape=jax.ShapeDtypeStruct((B, Lp, C), jnp.float32),
        grid=(B, Lp // tq),
        in_specs=[pl.BlockSpec((1, Lp, C), lambda b, q: (b, 0, 0))]   # full sequence
                 + [_invariant_spec(w.shape, sb) for w in weights],
        out_specs=pl.BlockSpec((1, tq, C), lambda b, q: (b, q, 0)),
        scratch_shapes=[pltpu.VMEM((Lp, C), jnp.bfloat16),            # Q
                        pltpu.VMEM((Lp, C), jnp.bfloat16),            # K
                        pltpu.VMEM((Lp, C), jnp.bfloat16)],           # V
        compiler_params=pltpu.CompilerParams(
            dimension_semantics=("parallel", "arbitrary"),
            vmem_limit_bytes=_vmem_limit_bytes()),
    )(x, *weights)


# ------------------- fused ln_post + cls projection --------------------------

def _ln_proj_kernel(x_ref, g_ref, b_ref, w_ref, o_ref):
    x = x_ref[...]
    m = jnp.mean(x, axis=-1, keepdims=True)
    v = jnp.mean(jnp.square(x - m), axis=-1, keepdims=True)
    y = (x - m) * jax.lax.rsqrt(v + 1e-5) * g_ref[...] + b_ref[...]
    o_ref[...] = jnp.dot(y.astype(jnp.bfloat16), w_ref[...],
                         preferred_element_type=jnp.float32)


def pallas_ln_proj(x, g, b, w):
    """Fused ln_post + projection of the cls tokens: LN(x) @ w, x (B,C)."""
    B, C = x.shape
    D = w.shape[1]
    Bp, Dp = _round_up(B, 8), _round_up(D, 128)   # lane-dense output
    xp = jnp.pad(x, ((0, Bp - B), (0, 0)))
    wp = jnp.pad(w.astype(jnp.bfloat16), ((0, 0), (0, Dp - D)))
    out = pl.pallas_call(
        _ln_proj_kernel,
        out_shape=jax.ShapeDtypeStruct((Bp, Dp), jnp.float32),
        grid=(1,),
        in_specs=[pl.BlockSpec((Bp, C), lambda i: (0, 0)),
                  pl.BlockSpec((1, C), lambda i: (0, 0)),
                  pl.BlockSpec((1, C), lambda i: (0, 0)),
                  pl.BlockSpec((C, Dp), lambda i: (0, 0))],
        out_specs=pl.BlockSpec((Bp, Dp), lambda i: (0, 0)),
    )(xp, g, b, wp)
    return out[:B, :D]


# ------------------------------ parameters -----------------------------------

def init_params(key, *, width, patch, kt, layers, input_res, num_frames,
                output_dim):
    """All linear weights are stored pre-transposed as (Din, Dout) and in bf16
    (MXU-native RHS layout, halves HBM/VMEM bytes)."""
    scale = width ** (-0.5)
    n_patches = (input_res // patch) ** 2
    keys = jax.random.split(key, 4 + layers)
    bf16 = jnp.bfloat16
    p = {
        'conv_w': 0.02 * jax.random.normal(
            keys[0], (width, 3, kt, patch, patch), jnp.float32),
        'cls_emb': scale * jax.random.normal(keys[1], (width,), jnp.float32),
        'pos_emb': scale * jax.random.normal(
            keys[2], (n_patches + 1, width), jnp.float32),
        'temp_emb': jnp.zeros((1, num_frames, width), jnp.float32),
        'ln_pre_g': jnp.ones((1, width), jnp.float32),
        'ln_pre_b': jnp.zeros((1, width), jnp.float32),
        'ln_post_g': jnp.ones((1, width), jnp.float32),
        'ln_post_b': jnp.zeros((1, width), jnp.float32),
        'proj': scale * jax.random.normal(
            keys[3], (width, output_dim), jnp.float32),
        'blocks': [],
    }
    for l in range(layers):
        k = jax.random.split(keys[4 + l], 8)
        p['blocks'].append({
            'ln1_g': jnp.ones((1, width), jnp.float32),
            'ln1_b': jnp.zeros((1, width), jnp.float32),
            'wqkv': (0.02 * jax.random.normal(k[0], (width, 3 * width))).astype(bf16),
            'bqkv': 0.02 * jax.random.normal(k[1], (1, 3 * width), jnp.float32),
            'wo': (0.02 * jax.random.normal(k[2], (width, width))).astype(bf16),
            'bo': 0.02 * jax.random.normal(k[3], (1, width), jnp.float32),
            'ln2_g': jnp.ones((1, width), jnp.float32),
            'ln2_b': jnp.zeros((1, width), jnp.float32),
            'wfc': (0.02 * jax.random.normal(k[4], (width, 4 * width))).astype(bf16),
            'bfc': 0.02 * jax.random.normal(k[5], (1, 4 * width), jnp.float32),
            'wpr': (0.02 * jax.random.normal(k[6], (4 * width, width))).astype(bf16),
            'bpr': 0.02 * jax.random.normal(k[7], (1, width), jnp.float32),
        })
    return p


# ------------------------------ forward pass ---------------------------------

def _embed(x, p, *, patch, kt, matmul=pallas_matmul):
    """Conv3d patch embedding (as matmul) + cls/pos/temporal embeddings."""
    B, Cin, T, H, W = x.shape
    width = p['conv_w'].shape[0]
    Tp, Hp, Wp = T // kt, H // patch, W // patch
    N = Hp * Wp
    xp = x.reshape(B, Cin, Tp, kt, Hp, patch, Wp, patch)
    xp = xp.transpose(0, 2, 4, 6, 1, 3, 5, 7)        # (B,Tp,Hp,Wp,Cin,kt,ps,ps)
    xp = xp.reshape(B * Tp * N, Cin * kt * patch * patch)
    wconv = p['conv_w'].reshape(width, -1).T          # (K, width)
    tok = matmul(xp, wconv).reshape(B, Tp, N, width)
    tok = tok + p['pos_emb'][1:][None, None]
    cls = (p['cls_emb'] + p['pos_emb'][0])[None, None, :]
    cls = jnp.broadcast_to(cls, (B, 1, width))        # == x[:B,:1,:] in torch
    tok = tok.transpose(0, 2, 1, 3)                   # '(b t) n m -> (b n) t m'
    if Tp == 1:
        tok = tok + jnp.mean(p['temp_emb'], axis=1)[None]
    else:
        tok = tok + p['temp_emb'][None]
    tok = tok.reshape(B, N * Tp, width)               # '(b n) t m -> b (n t) m'
    return jnp.concatenate([cls, tok], axis=1)        # (B, L, C)


def vit_forward(x, p, *, patch, kt, heads, tq=None):
    seq = _embed(x, p, patch=patch, kt=kt)
    B, L, C = seq.shape

    seq = pallas_layernorm(seq, p['ln_pre_g'], p['ln_pre_b'])

    # Pad the sequence once to a multiple of the query tile; padded keys are
    # masked inside the attention kernel, padded rows never influence real
    # rows, and only the (real) cls row is consumed at the end.
    if tq is None:
        tq = _default_tq()
    tq_eff = min(tq, _round_up(L, 8))
    Lp = _round_up(L, tq_eff)
    seq = jnp.pad(seq, ((0, 0), (0, Lp - L), (0, 0)))
    for blk in p['blocks']:
        seq = pallas_block(seq, blk, n_head=heads, seq_len=L, tq=tq_eff)

    # ln_post fused with the cls-token projection (only x[0] reaches proj).
    return pallas_ln_proj(seq[:, 0, :], p['ln_post_g'], p['ln_post_b'], p['proj'])


# ------------------------- pure-JAX f32 reference ----------------------------

def _ln_ref(t, g, b):
    m = jnp.mean(t, -1, keepdims=True)
    var = jnp.mean(jnp.square(t - m), -1, keepdims=True)
    return (t - m) * jax.lax.rsqrt(var + 1e-5) * g + b


def vit_forward_ref(x, p, *, patch, kt, heads):
    f32 = jnp.float32
    seq = _embed(x, p, patch=patch, kt=kt, matmul=lambda a, b: a @ b)
    B, L, C = seq.shape
    hd = C // heads
    seq = _ln_ref(seq, p['ln_pre_g'], p['ln_pre_b'])
    for blk in p['blocks']:
        y = _ln_ref(seq, blk['ln1_g'], blk['ln1_b'])
        qkv = y @ blk['wqkv'].astype(f32) + blk['bqkv']
        q, k, v = jnp.split(qkv, 3, axis=-1)
        q = q.reshape(B, L, heads, hd).transpose(0, 2, 1, 3)
        k = k.reshape(B, L, heads, hd).transpose(0, 2, 1, 3)
        v = v.reshape(B, L, heads, hd).transpose(0, 2, 1, 3)
        s = jnp.einsum('bhqd,bhkd->bhqk', q, k) / math.sqrt(hd)
        w_att = jax.nn.softmax(s, axis=-1)
        o = jnp.einsum('bhqk,bhkd->bhqd', w_att, v)
        o = o.transpose(0, 2, 1, 3).reshape(B, L, C)
        seq = seq + o @ blk['wo'].astype(f32) + blk['bo']
        y2 = _ln_ref(seq, blk['ln2_g'], blk['ln2_b'])
        h1 = y2 @ blk['wfc'].astype(f32) + blk['bfc']
        h1 = h1 * jax.nn.sigmoid(1.702 * h1)
        seq = seq + h1 @ blk['wpr'].astype(f32) + blk['bpr']
    seq = _ln_ref(seq, p['ln_post_g'], p['ln_post_b'])
    return seq[:, 0, :] @ p['proj']


# ---------------------------------- main --------------------------------------

if __name__ == "__main__":
    B = 2
    INPUT_RES, PATCH, WIDTH, LAYERS, HEADS = 16, 8, 32, 2, 4
    OUTPUT_DIM, KT, NUM_FRAMES = 16, 1, 4

    key = jax.random.PRNGKey(0)
    kx, kp = jax.random.split(key)
    x = jax.random.normal(kx, (B, 3, NUM_FRAMES, INPUT_RES, INPUT_RES),
                          jnp.float32)
    params = init_params(kp, width=WIDTH, patch=PATCH, kt=KT, layers=LAYERS,
                         input_res=INPUT_RES, num_frames=NUM_FRAMES,
                         output_dim=OUTPUT_DIM)

    _single_buffer_supported()   # run the capability probe once, outside tracing

    fwd = jax.jit(functools.partial(vit_forward, patch=PATCH, kt=KT,
                                    heads=HEADS))
    out = jax.block_until_ready(fwd(x, params))

    assert out.shape == (B, OUTPUT_DIM)
    assert bool(jnp.all(jnp.isfinite(out)))

    # Validate against a pure-JAX f32 reference (bf16 MXU inputs -> tolerance).
    ref = vit_forward_ref(x, params, patch=PATCH, kt=KT, heads=HEADS)
    err = float(jnp.max(jnp.abs(out - ref)))
    assert err < 1e-1, f"max abs err vs reference: {err}"

    print("KERNEL_OK")
</pallas_src>

<mosaic_0001>
module attributes {stable_mosaic.version = 11 : i64} {
  func.func @_probe(%arg0: i32, %arg1: memref<8x128xf32, #tpu.memory_space<vmem>>, %arg2: memref<8x128xf32, #tpu.memory_space<vmem>>) attributes {dimension_semantics = [#tpu.dimension_semantics<arbitrary>], iteration_bounds = array<i64: 2>, scalar_prefetch = 0 : i64, scratch_operands = 0 : i64, tpu.core_type = #tpu.core_type<tc>, window_params = [{pipeline_mode = #tpu.pipeline_mode<synchronous>, transform_indices = @transform_0, window_bounds = array<i64: 8, 128>}, {pipeline_mode = #tpu.pipeline_mode<synchronous>, transform_indices = @transform_1, window_bounds = array<i64: 8, 128>}]} {
    %c0 = arith.constant 0 : index
    %c0_0 = arith.constant 0 : index
    %0 = vector.load %arg1[%c0, %c0_0] : memref<8x128xf32, #tpu.memory_space<vmem>>, vector<8x128xf32>
    %cst = arith.constant 1.000000e+00 : f32
    %1 = vector.broadcast %cst : f32 to vector<8x128xf32>
    %2 = arith.addf %0, %1 : vector<8x128xf32>
    %c0_1 = arith.constant 0 : index
    %c0_2 = arith.constant 0 : index
    %3 = vector.load %arg2[%c0_1, %c0_2] : memref<8x128xf32, #tpu.memory_space<vmem>>, vector<8x128xf32>
    tpu.vector_store %arg2[%c0_1, %c0_2], %2 {strides = array<i32>} : memref<8x128xf32, #tpu.memory_space<vmem>>, vector<8x128xf32>,
    return
  }
  func.func @transform_0(%arg0: i32) -> (i32, i32) {
    %c0_i32 = arith.constant 0 : i32
    %c0_i32_0 = arith.constant 0 : i32
    %c0_i32_1 = arith.constant 0 : i32
    return %c0_i32, %c0_i32_0 : i32, i32
  }
  func.func @transform_1(%arg0: i32) -> (i32, i32) {
    %c0_i32 = arith.constant 0 : i32
    %c0_i32_0 = arith.constant 0 : i32
    %c0_i32_1 = arith.constant 0 : i32
    return %c0_i32, %c0_i32_0 : i32, i32
  }
}

module attributes {stable_mosaic.version = 11 : i64} {
  func.func @_matmul_kernel(%arg0: i32, %arg1: i32, %arg2: i32, %arg3: memref<32x256xbf16, #tpu.memory_space<vmem>>, %arg4: memref<256x128xbf16, #tpu.memory_space<vmem>>, %arg5: memref<32x128xf32, #tpu.memory_space<vmem>>) attributes {dimension_semantics = [#tpu.dimension_semantics<parallel>, #tpu.dimension_semantics<parallel>, #tpu.dimension_semantics<arbitrary>], iteration_bounds = array<i64: 1, 1, 1>, scalar_prefetch = 0 : i64, scratch_operands = 0 : i64, tpu.core_type = #tpu.core_type<tc>, window_params = [{transform_indices = @transform_0, window_bounds = array<i64: 32, 256>}, {transform_indices = @transform_1, window_bounds = array<i64: 256, 128>}, {transform_indices = @transform_2, window_bounds = array<i64: 32, 128>}]} {
    %c0_i32 = arith.constant 0 : i32
    %0 = arith.cmpi eq, %arg2, %c0_i32 : i32
    %1 = arith.extui %0 : i1 to i32
    %c0_i32_0 = arith.constant 0 : i32
    %2 = arith.cmpi ne, %1, %c0_i32_0 : i32
    scf.if %2 {
      %cst_8 = arith.constant 0.000000e+00 : f32
      %9 = vector.broadcast %cst_8 : f32 to vector<32x128xf32>
      %c0_9 = arith.constant 0 : index
      %c0_10 = arith.constant 0 : index
      %10 = vector.load %arg5[%c0_9, %c0_10] : memref<32x128xf32, #tpu.memory_space<vmem>>, vector<32x128xf32>
      tpu.vector_store %arg5[%c0_9, %c0_10], %9 {strides = array<i32>} : memref<32x128xf32, #tpu.memory_space<vmem>>, vector<32x128xf32>,
    } else {
    }
    %c0 = arith.constant 0 : index
    %c0_1 = arith.constant 0 : index
    %3 = vector.load %arg5[%c0, %c0_1] : memref<32x128xf32, #tpu.memory_space<vmem>>, vector<32x128xf32>
    %c0_2 = arith.constant 0 : index
    %c0_3 = arith.constant 0 : index
    %4 = vector.load %arg3[%c0_2, %c0_3] : memref<32x256xbf16, #tpu.memory_space<vmem>>, vector<32x256xbf16>
    %c0_4 = arith.constant 0 : index
    %c0_5 = arith.constant 0 : index
    %5 = vector.load %arg4[%c0_4, %c0_5] : memref<256x128xbf16, #tpu.memory_space<vmem>>, vector<256x128xbf16>
    %cst = arith.constant dense<0.000000e+00> : vector<32x128xf32>
    %6 = tpu.matmul %4, %5, %cst {dimension_numbers = #tpu.dot_dimension_numbers<[1], [0], [0], [1], [0, 0, 1, 1], [], []>} : vector<32x256xbf16>, vector<256x128xbf16>, vector<32x128xf32> -> vector<32x128xf32>
    %7 = arith.addf %3, %6 : vector<32x128xf32>
    %c0_6 = arith.constant 0 : index
    %c0_7 = arith.constant 0 : index
    %8 = vector.load %arg5[%c0_6, %c0_7] : memref<32x128xf32, #tpu.memory_space<vmem>>, vector<32x128xf32>
    tpu.vector_store %arg5[%c0_6, %c0_7], %7 {strides = array<i32>} : memref<32x128xf32, #tpu.memory_space<vmem>>, vector<32x128xf32>,
    return
  }
  func.func @transform_0(%arg0: i32, %arg1: i32, %arg2: i32) -> (i32, i32) {
    %c0_i32 = arith.constant 0 : i32
    return %arg0, %arg2 : i32, i32
  }
  func.func @transform_1(%arg0: i32, %arg1: i32, %arg2: i32) -> (i32, i32) {
    %c0_i32 = arith.constant 0 : i32
    return %arg2, %arg1 : i32, i32
  }
  func.func @transform_2(%arg0: i32, %arg1: i32, %arg2: i32) -> (i32, i32) {
    %c0_i32 = arith.constant 0 : i32
    return %arg0, %arg1 : i32, i32
  }
}

module attributes {stable_mosaic.version = 11 : i64} {
  func.func @_layernorm_kernel(%arg0: i32, %arg1: memref<40x32xf32, #tpu.memory_space<vmem>>, %arg2: memref<1x32xf32, #tpu.memory_space<vmem>>, %arg3: memref<1x32xf32, #tpu.memory_space<vmem>>, %arg4: memref<40x32xf32, #tpu.memory_space<vmem>>) attributes {dimension_semantics = [#tpu.dimension_semantics<parallel>], iteration_bounds = array<i64: 1>, scalar_prefetch = 0 : i64, scratch_operands = 0 : i64, tpu.core_type = #tpu.core_type<tc>, window_params = [{transform_indices = @transform_0, window_bounds = array<i64: 40, 32>}, {pipeline_mode = #tpu.pipeline_mode<synchronous>, transform_indices = @transform_1, window_bounds = array<i64: 1, 32>}, {pipeline_mode = #tpu.pipeline_mode<synchronous>, transform_indices = @transform_2, window_bounds = array<i64: 1, 32>}, {transform_indices = @transform_3, window_bounds = array<i64: 40, 32>}]} {
    %c0 = arith.constant 0 : index
    %c0_0 = arith.constant 0 : index
    %0 = vector.load %arg1[%c0, %c0_0] : memref<40x32xf32, #tpu.memory_space<vmem>>, vector<40x32xf32>
    %cst = arith.constant dense<0.000000e+00> : vector<40xf32>
    %1 = vector.multi_reduction <add>, %0, %cst [1] : vector<40x32xf32> to vector<40xf32>
    %2 = vector.shape_cast %1 : vector<40xf32> to vector<40x1xf32>
    %cst_1 = arith.constant 3.200000e+01 : f32
    %3 = vector.broadcast %cst_1 : f32 to vector<40x1xf32>
    %4 = arith.divf %2, %3 : vector<40x1xf32>
    %5 = vector.broadcast %4 : vector<40x1xf32> to vector<40x32xf32>
    %6 = arith.subf %0, %5 : vector<40x32xf32>
    %7 = arith.mulf %6, %6 : vector<40x32xf32>
    %cst_2 = arith.constant dense<0.000000e+00> : vector<40xf32>
    %8 = vector.multi_reduction <add>, %7, %cst_2 [1] : vector<40x32xf32> to vector<40xf32>
    %9 = vector.shape_cast %8 : vector<40xf32> to vector<40x1xf32>
    %cst_3 = arith.constant 3.200000e+01 : f32
    %10 = vector.broadcast %cst_3 : f32 to vector<40x1xf32>
    %11 = arith.divf %9, %10 : vector<40x1xf32>
    %12 = vector.broadcast %4 : vector<40x1xf32> to vector<40x32xf32>
    %13 = arith.subf %0, %12 : vector<40x32xf32>
    %cst_4 = arith.constant 9.99999974E-6 : f32
    %14 = vector.broadcast %cst_4 : f32 to vector<40x1xf32>
    %15 = arith.addf %11, %14 : vector<40x1xf32>
    %16 = math.rsqrt %15 : vector<40x1xf32>
    %17 = vector.broadcast %16 : vector<40x1xf32> to vector<40x32xf32>
    %18 = arith.mulf %13, %17 : vector<40x32xf32>
    %c0_5 = arith.constant 0 : index
    %c0_6 = arith.constant 0 : index
    %19 = vector.load %arg2[%c0_5, %c0_6] : memref<1x32xf32, #tpu.memory_space<vmem>>, vector<1x32xf32>
    %20 = vector.broadcast %19 : vector<1x32xf32> to vector<40x32xf32>
    %21 = arith.mulf %18, %20 : vector<40x32xf32>
    %c0_7 = arith.constant 0 : index
    %c0_8 = arith.constant 0 : index
    %22 = vector.load %arg3[%c0_7, %c0_8] : memref<1x32xf32, #tpu.memory_space<vmem>>, vector<1x32xf32>
    %23 = vector.broadcast %22 : vector<1x32xf32> to vector<40x32xf32>
    %24 = arith.addf %21, %23 : vector<40x32xf32>
    %c0_9 = arith.constant 0 : index
    %c0_10 = arith.constant 0 : index
    %25 = vector.load %arg4[%c0_9, %c0_10] : memref<40x32xf32, #tpu.memory_space<vmem>>, vector<40x32xf32>
    tpu.vector_store %arg4[%c0_9, %c0_10], %24 {strides = array<i32>} : memref<40x32xf32, #tpu.memory_space<vmem>>, vector<40x32xf32>,
    return
  }
  func.func @transform_0(%arg0: i32) -> (i32, i32) {
    %c0_i32 = arith.constant 0 : i32
    %c0_i32_0 = arith.constant 0 : i32
    return %arg0, %c0_i32 : i32, i32
  }
  func.func @transform_1(%arg0: i32) -> (i32, i32) {
    %c0_i32 = arith.constant 0 : i32
    %c0_i32_0 = arith.constant 0 : i32
    %c0_i32_1 = arith.constant 0 : i32
    return %c0_i32, %c0_i32_0 : i32, i32
  }
  func.func @transform_2(%arg0: i32) -> (i32, i32) {
    %c0_i32 = arith.constant 0 : i32
    %c0_i32_0 = arith.constant 0 : i32
    %c0_i32_1 = arith.constant 0 : i32
    return %c0_i32, %c0_i32_0 : i32, i32
  }
  func.func @transform_3(%arg0: i32) -> (i32, i32) {
    %c0_i32 = arith.constant 0 : i32
    %c0_i32_0 = arith.constant 0 : i32
    return %arg0, %c0_i32 : i32, i32
  }
}

module attributes {stable_mosaic.version = 11 : i64} {
  func.func @_ln_proj_kernel(%arg0: i32, %arg1: memref<8x32xf32, #tpu.memory_space<vmem>>, %arg2: memref<1x32xf32, #tpu.memory_space<vmem>>, %arg3: memref<1x32xf32, #tpu.memory_space<vmem>>, %arg4: memref<32x128xbf16, #tpu.memory_space<vmem>>, %arg5: memref<8x128xf32, #tpu.memory_space<vmem>>) attributes {dimension_semantics = [#tpu.dimension_semantics<arbitrary>], iteration_bounds = array<i64: 1>, scalar_prefetch = 0 : i64, scratch_operands = 0 : i64, tpu.core_type = #tpu.core_type<tc>, window_params = [{pipeline_mode = #tpu.pipeline_mode<synchronous>, transform_indices = @transform_0, window_bounds = array<i64: 8, 32>}, {pipeline_mode = #tpu.pipeline_mode<synchronous>, transform_indices = @transform_1, window_bounds = array<i64: 1, 32>}, {pipeline_mode = #tpu.pipeline_mode<synchronous>, transform_indices = @transform_2, window_bounds = array<i64: 1, 32>}, {pipeline_mode = #tpu.pipeline_mode<synchronous>, transform_indices = @transform_3, window_bounds = array<i64: 32, 128>}, {pipeline_mode = #tpu.pipeline_mode<synchronous>, transform_indices = @transform_4, window_bounds = array<i64: 8, 128>}]} {
    %c0 = arith.constant 0 : index
    %c0_0 = arith.constant 0 : index
    %0 = vector.load %arg1[%c0, %c0_0] : memref<8x32xf32, #tpu.memory_space<vmem>>, vector<8x32xf32>
    %cst = arith.constant dense<0.000000e+00> : vector<8xf32>
    %1 = vector.multi_reduction <add>, %0, %cst [1] : vector<8x32xf32> to vector<8xf32>
    %2 = vector.shape_cast %1 : vector<8xf32> to vector<8x1xf32>
    %cst_1 = arith.constant 3.200000e+01 : f32
    %3 = vector.broadcast %cst_1 : f32 to vector<8x1xf32>
    %4 = arith.divf %2, %3 : vector<8x1xf32>
    %5 = vector.broadcast %4 : vector<8x1xf32> to vector<8x32xf32>
    %6 = arith.subf %0, %5 : vector<8x32xf32>
    %7 = arith.mulf %6, %6 : vector<8x32xf32>
    %cst_2 = arith.constant dense<0.000000e+00> : vector<8xf32>
    %8 = vector.multi_reduction <add>, %7, %cst_2 [1] : vector<8x32xf32> to vector<8xf32>
    %9 = vector.shape_cast %8 : vector<8xf32> to vector<8x1xf32>
    %cst_3 = arith.constant 3.200000e+01 : f32
    %10 = vector.broadcast %cst_3 : f32 to vector<8x1xf32>
    %11 = arith.divf %9, %10 : vector<8x1xf32>
    %12 = vector.broadcast %4 : vector<8x1xf32> to vector<8x32xf32>
    %13 = arith.subf %0, %12 : vector<8x32xf32>
    %cst_4 = arith.constant 9.99999974E-6 : f32
    %14 = vector.broadcast %cst_4 : f32 to vector<8x1xf32>
    %15 = arith.addf %11, %14 : vector<8x1xf32>
    %16 = math.rsqrt %15 : vector<8x1xf32>
    %17 = vector.broadcast %16 : vector<8x1xf32> to vector<8x32xf32>
    %18 = arith.mulf %13, %17 : vector<8x32xf32>
    %c0_5 = arith.constant 0 : index
    %c0_6 = arith.constant 0 : index
    %19 = vector.load %arg2[%c0_5, %c0_6] : memref<1x32xf32, #tpu.memory_space<vmem>>, vector<1x32xf32>
    %20 = vector.broadcast %19 : vector<1x32xf32> to vector<8x32xf32>
    %21 = arith.mulf %18, %20 : vector<8x32xf32>
    %c0_7 = arith.constant 0 : index
    %c0_8 = arith.constant 0 : index
    %22 = vector.load %arg3[%c0_7, %c0_8] : memref<1x32xf32, #tpu.memory_space<vmem>>, vector<1x32xf32>
    %23 = vector.broadcast %22 : vector<1x32xf32> to vector<8x32xf32>
    %24 = arith.addf %21, %23 : vector<8x32xf32>
    %25 = arith.truncf %24 : vector<8x32xf32> to vector<8x32xbf16>
    %c0_9 = arith.constant 0 : index
    %c0_10 = arith.constant 0 : index
    %26 = vector.load %arg4[%c0_9, %c0_10] : memref<32x128xbf16, #tpu.memory_space<vmem>>, vector<32x128xbf16>
    %cst_11 = arith.constant dense<0.000000e+00> : vector<8x128xf32>
    %27 = tpu.matmul %25, %26, %cst_11 {dimension_numbers = #tpu.dot_dimension_numbers<[1], [0], [0], [1], [0, 0, 1, 1], [], []>} : vector<8x32xbf16>, vector<32x128xbf16>, vector<8x128xf32> -> vector<8x128xf32>
    %c0_12 = arith.constant 0 : index
    %c0_13 = arith.constant 0 : index
    %28 = vector.load %arg5[%c0_12, %c0_13] : memref<8x128xf32, #tpu.memory_space<vmem>>, vector<8x128xf32>
    tpu.vector_store %arg5[%c0_12, %c0_13], %27 {strides = array<i32>} : memref<8x128xf32, #tpu.memory_space<vmem>>, vector<8x128xf32>,
    return
  }
  func.func @transform_0(%arg0: i32) -> (i32, i32) {
    %c0_i32 = arith.constant 0 : i32
    %c0_i32_0 = arith.constant 0 : i32
    %c0_i32_1 = arith.constant 0 : i32
    return %c0_i32, %c0_i32_0 : i32, i32
  }
  func.func @transform_1(%arg0: i32) -> (i32, i32) {
    %c0_i32 = arith.constant 0 : i32
    %c0_i32_0 = arith.constant 0 : i32
    %c0_i32_1 = arith.constant 0 : i32
    return %c0_i32, %c0_i32_0 : i32, i32
  }
  func.func @transform_2(%arg0: i32) -> (i32, i32) {
    %c0_i32 = arith.constant 0 : i32
    %c0_i32_0 = arith.constant 0 : i32
    %c0_i32_1 = arith.constant 0 : i32
    return %c0_i32, %c0_i32_0 : i32, i32
  }
  func.func @transform_3(%arg0: i32) -> (i32, i32) {
    %c0_i32 = arith.constant 0 : i32
    %c0_i32_0 = arith.constant 0 : i32
    %c0_i32_1 = arith.constant 0 : i32
    return %c0_i32, %c0_i32_0 : i32, i32
  }
  func.func @transform_4(%arg0: i32) -> (i32, i32) {
    %c0_i32 = arith.constant 0 : i32
    %c0_i32_0 = arith.constant 0 : i32
    %c0_i32_1 = arith.constant 0 : i32
    return %c0_i32, %c0_i32_0 : i32, i32
  }
}

module attributes {stable_mosaic.version = 11 : i64} {
  func.func @_block_kernel(%arg0: i32, %arg1: i32, %arg2: memref<1x24x32xf32, #tpu.memory_space<vmem>>, %arg3: memref<1x32xf32, #tpu.memory_space<vmem>>, %arg4: memref<1x32xf32, #tpu.memory_space<vmem>>, %arg5: memref<32x96xbf16, #tpu.memory_space<vmem>>, %arg6: memref<1x96xf32, #tpu.memory_space<vmem>>, %arg7: memref<32x32xbf16, #tpu.memory_space<vmem>>, %arg8: memref<1x32xf32, #tpu.memory_space<vmem>>, %arg9: memref<1x32xf32, #tpu.memory_space<vmem>>, %arg10: memref<1x32xf32, #tpu.memory_space<vmem>>, %arg11: memref<32x128xbf16, #tpu.memory_space<vmem>>, %arg12: memref<1x128xf32, #tpu.memory_space<vmem>>, %arg13: memref<128x32xbf16, #tpu.memory_space<vmem>>, %arg14: memref<1x32xf32, #tpu.memory_space<vmem>>, %arg15: memref<1x24x32xf32, #tpu.memory_space<vmem>>, %arg16: memref<24x32xbf16, #tpu.memory_space<vmem>>, %arg17: memref<24x32xbf16, #tpu.memory_space<vmem>>, %arg18: memref<24x32xbf16, #tpu.memory_space<vmem>>) attributes {dimension_semantics = [#tpu.dimension_semantics<parallel>, #tpu.dimension_semantics<arbitrary>], iteration_bounds = array<i64: 2, 1>, scalar_prefetch = 0 : i64, scratch_operands = 3 : i64, tpu.core_type = #tpu.core_type<tc>, window_params = [{transform_indices = @transform_0, window_bounds = array<i64: 1, 24, 32>}, {pipeline_mode = #tpu.pipeline_mode<synchronous>, transform_indices = @transform_1, window_bounds = array<i64: 1, 32>}, {pipeline_mode = #tpu.pipeline_mode<synchronous>, transform_indices = @transform_2, window_bounds = array<i64: 1, 32>}, {pipeline_mode = #tpu.pipeline_mode<synchronous>, transform_indices = @transform_3, window_bounds = array<i64: 32, 96>}, {pipeline_mode = #tpu.pipeline_mode<synchronous>, transform_indices = @transform_4, window_bounds = array<i64: 1, 96>}, {pipeline_mode = #tpu.pipeline_mode<synchronous>, transform_indices = @transform_5, window_bounds = array<i64: 32, 32>}, {pipeline_mode = #tpu.pipeline_mode<synchronous>, transform_indices = @transform_6, window_bounds = array<i64: 1, 32>}, {pipeline_mode = #tpu.pipeline_mode<synchronous>, transform_indices = @transform_7, window_bounds = array<i64: 1, 32>}, {pipeline_mode = #tpu.pipeline_mode<synchronous>, transform_indices = @transform_8, window_bounds = array<i64: 1, 32>}, {pipeline_mode = #tpu.pipeline_mode<synchronous>, transform_indices = @transform_9, window_bounds = array<i64: 32, 128>}, {pipeline_mode = #tpu.pipeline_mode<synchronous>, transform_indices = @transform_10, window_bounds = array<i64: 1, 128>}, {pipeline_mode = #tpu.pipeline_mode<synchronous>, transform_indices = @transform_11, window_bounds = array<i64: 128, 32>}, {pipeline_mode = #tpu.pipeline_mode<synchronous>, transform_indices = @transform_12, window_bounds = array<i64: 1, 32>}, {transform_indices = @transform_13, window_bounds = array<i64: 1, 24, 32>}]} {
    %c0_i32 = arith.constant 0 : i32
    %0 = arith.cmpi eq, %arg1, %c0_i32 : i32
    %1 = arith.extui %0 : i1 to i32
    %c0_i32_0 = arith.constant 0 : i32
    %2 = arith.cmpi ne, %1, %c0_i32_0 : i32
    scf.if %2 {
      %c0_44 = arith.constant 0 : index
      %c0_45 = arith.constant 0 : index
      %c0_46 = arith.constant 0 : index
      %96 = vector.load %arg2[%c0_44, %c0_45, %c0_46] : memref<1x24x32xf32, #tpu.memory_space<vmem>>, vector<1x24x32xf32>
      %97 = vector.shape_cast %96 : vector<1x24x32xf32> to vector<24x32xf32>
      %c0_47 = arith.constant 0 : index
      %c0_48 = arith.constant 0 : index
      %98 = vector.load %arg3[%c0_47, %c0_48] : memref<1x32xf32, #tpu.memory_space<vmem>>, vector<1x32xf32>
      %c0_49 = arith.constant 0 : index
      %c0_50 = arith.constant 0 : index
      %99 = vector.load %arg4[%c0_49, %c0_50] : memref<1x32xf32, #tpu.memory_space<vmem>>, vector<1x32xf32>
      %cst_51 = arith.constant dense<0.000000e+00> : vector<24xf32>
      %100 = vector.multi_reduction <add>, %97, %cst_51 [1] : vector<24x32xf32> to vector<24xf32>
      %101 = vector.shape_cast %100 : vector<24xf32> to vector<24x1xf32>
      %cst_52 = arith.constant 3.200000e+01 : f32
      %102 = vector.broadcast %cst_52 : f32 to vector<24x1xf32>
      %103 = arith.divf %101, %102 : vector<24x1xf32>
      %104 = vector.broadcast %103 : vector<24x1xf32> to vector<24x32xf32>
      %105 = arith.subf %97, %104 : vector<24x32xf32>
      %106 = arith.mulf %105, %105 : vector<24x32xf32>
      %cst_53 = arith.constant dense<0.000000e+00> : vector<24xf32>
      %107 = vector.multi_reduction <add>, %106, %cst_53 [1] : vector<24x32xf32> to vector<24xf32>
      %108 = vector.shape_cast %107 : vector<24xf32> to vector<24x1xf32>
      %cst_54 = arith.constant 3.200000e+01 : f32
      %109 = vector.broadcast %cst_54 : f32 to vector<24x1xf32>
      %110 = arith.divf %108, %109 : vector<24x1xf32>
      %111 = vector.broadcast %103 : vector<24x1xf32> to vector<24x32xf32>
      %112 = arith.subf %97, %111 : vector<24x32xf32>
      %cst_55 = arith.constant 9.99999974E-6 : f32
      %113 = vector.broadcast %cst_55 : f32 to vector<24x1xf32>
      %114 = arith.addf %110, %113 : vector<24x1xf32>
      %115 = math.rsqrt %114 : vector<24x1xf32>
      %116 = vector.broadcast %115 : vector<24x1xf32> to vector<24x32xf32>
      %117 = arith.mulf %112, %116 : vector<24x32xf32>
      %118 = vector.broadcast %98 : vector<1x32xf32> to vector<24x32xf32>
      %119 = arith.mulf %117, %118 : vector<24x32xf32>
      %120 = vector.broadcast %99 : vector<1x32xf32> to vector<24x32xf32>
      %121 = arith.addf %119, %120 : vector<24x32xf32>
      %122 = arith.truncf %121 : vector<24x32xf32> to vector<24x32xbf16>
      %c0_56 = arith.constant 0 : index
      %c0_57 = arith.constant 0 : index
      %123 = vector.load %arg5[%c0_56, %c0_57] : memref<32x96xbf16, #tpu.memory_space<vmem>>, vector<32x96xbf16>
      %cst_58 = arith.constant dense<0.000000e+00> : vector<24x96xf32>
      %124 = tpu.matmul %122, %123, %cst_58 {dimension_numbers = #tpu.dot_dimension_numbers<[1], [0], [0], [1], [0, 0, 1, 1], [], []>} : vector<24x32xbf16>, vector<32x96xbf16>, vector<24x96xf32> -> vector<24x96xf32>
      %c0_59 = arith.constant 0 : index
      %c0_60 = arith.constant 0 : index
      %125 = vector.load %arg6[%c0_59, %c0_60] : memref<1x96xf32, #tpu.memory_space<vmem>>, vector<1x96xf32>
      %126 = vector.broadcast %125 : vector<1x96xf32> to vector<24x96xf32>
      %127 = arith.addf %124, %126 : vector<24x96xf32>
      %128 = vector.extract_strided_slice %127 {offsets = [0, 0], sizes = [24, 32], strides = [1, 1]} : vector<24x96xf32> to vector<24x32xf32>
      %129 = arith.truncf %128 : vector<24x32xf32> to vector<24x32xbf16>
      %c0_61 = arith.constant 0 : index
      %c0_62 = arith.constant 0 : index
      %130 = vector.load %arg16[%c0_61, %c0_62] : memref<24x32xbf16, #tpu.memory_space<vmem>>, vector<24x32xbf16>
      tpu.vector_store %arg16[%c0_61, %c0_62], %129 {strides = array<i32>} : memref<24x32xbf16, #tpu.memory_space<vmem>>, vector<24x32xbf16>,
      %131 = vector.extract_strided_slice %127 {offsets = [0, 32], sizes = [24, 32], strides = [1, 1]} : vector<24x96xf32> to vector<24x32xf32>
      %132 = arith.truncf %131 : vector<24x32xf32> to vector<24x32xbf16>
      %c0_63 = arith.constant 0 : index
      %c0_64 = arith.constant 0 : index
      %133 = vector.load %arg17[%c0_63, %c0_64] : memref<24x32xbf16, #tpu.memory_space<vmem>>, vector<24x32xbf16>
      tpu.vector_store %arg17[%c0_63, %c0_64], %132 {strides = array<i32>} : memref<24x32xbf16, #tpu.memory_space<vmem>>, vector<24x32xbf16>,
      %134 = vector.extract_strided_slice %127 {offsets = [0, 64], sizes = [24, 32], strides = [1, 1]} : vector<24x96xf32> to vector<24x32xf32>
      %135 = arith.truncf %134 : vector<24x32xf32> to vector<24x32xbf16>
      %c0_65 = arith.constant 0 : index
      %c0_66 = arith.constant 0 : index
      %136 = vector.load %arg18[%c0_65, %c0_66] : memref<24x32xbf16, #tpu.memory_space<vmem>>, vector<24x32xbf16>
      tpu.vector_store %arg18[%c0_65, %c0_66], %135 {strides = array<i32>} : memref<24x32xbf16, #tpu.memory_space<vmem>>, vector<24x32xbf16>,
    } else {
    }
    %c24_i32 = arith.constant 24 : i32
    %3 = arith.muli %arg1, %c24_i32 : i32
    %4 = tpu.assume_multiple %3, 24 : i32
    %c0_i32_1 = arith.constant 0 : i32
    %c0_i32_2 = arith.constant 0 : i32
    %c0_i32_3 = arith.constant 0 : i32
    %5 = tpu.memref_slice %arg2[%c0_i32_1, %c0_i32_2, %c0_i32_3] : memref<1x24x32xf32, #tpu.memory_space<vmem>> -> memref<1x24x32xf32, #tpu.memory_space<vmem>>
    %6 = tpu.memref_squeeze %5 : memref<1x24x32xf32, #tpu.memory_space<vmem>> -> memref<24x32xf32, #tpu.memory_space<vmem>>
    %7 = arith.index_cast %4 : i32 to index
    %c0 = arith.constant 0 : index
    %8 = vector.load %6[%7, %c0] : memref<24x32xf32, #tpu.memory_space<vmem>>, vector<24x32xf32>
    %9 = arith.index_cast %4 : i32 to index
    %c0_4 = arith.constant 0 : index
    %10 = vector.load %arg16[%9, %c0_4] : memref<24x32xbf16, #tpu.memory_space<vmem>>, vector<24x32xbf16>
    %11 = vector.shape_cast %10 : vector<24x32xbf16> to vector<24x4x8xbf16>
    %c0_5 = arith.constant 0 : index
    %c0_6 = arith.constant 0 : index
    %12 = vector.load %arg17[%c0_5, %c0_6] : memref<24x32xbf16, #tpu.memory_space<vmem>>, vector<24x32xbf16>
    %13 = vector.shape_cast %12 : vector<24x32xbf16> to vector<24x4x8xbf16>
    %c0_7 = arith.constant 0 : index
    %c0_8 = arith.constant 0 : index
    %14 = vector.load %arg18[%c0_7, %c0_8] : memref<24x32xbf16, #tpu.memory_space<vmem>>, vector<24x32xbf16>
    %15 = vector.shape_cast %14 : vector<24x32xbf16> to vector<24x4x8xbf16>
    "tpu.trace_start"() <{level = 10 : i32, message = "qhd,khd->hqk"}> : () -> ()
    %cst = arith.constant dense<0.000000e+00> : vector<4x24x24xf32>
    %16 = tpu.matmul %11, %13, %cst {dimension_numbers = #tpu.dot_dimension_numbers<[2], [2], [0], [0], [0, 1, 0, 0, 1, 0], [1], [1]>} : vector<24x4x8xbf16>, vector<24x4x8xbf16>, vector<4x24x24xf32> -> vector<4x24x24xf32>
    "tpu.trace_stop"() : () -> ()
    %cst_9 = arith.constant 0.353553385 : f32
    %17 = vector.broadcast %cst_9 : f32 to vector<4x24x24xf32>
    %18 = arith.mulf %16, %17 : vector<4x24x24xf32>
    %19 = tpu.iota {dimensions = array<i32: 2>} : vector<1x1x24xi32>
    %c17_i32 = arith.constant 17 : i32
    %20 = vector.broadcast %c17_i32 : i32 to vector<1x1x24xi32>
    %21 = arith.cmpi slt, %19, %20 : vector<1x1x24xi32>
    %cst_10 = arith.constant 0.000000e+00 : f32
    %cst_11 = arith.constant -1.000000e+30 : f32
    %22 = vector.broadcast %cst_10 : f32 to vector<1x1x24xf32>
    %23 = vector.broadcast %cst_11 : f32 to vector<1x1x24xf32>
    %24 = arith.select %21, %22, %23 : vector<1x1x24xi1>, vector<1x1x24xf32>
    %25 = vector.broadcast %24 : vector<1x1x24xf32> to vector<4x24x24xf32>
    %26 = arith.addf %18, %25 : vector<4x24x24xf32>
    %cst_12 = arith.constant dense<0xFF800000> : vector<4x24xf32>
    %27 = vector.multi_reduction <maximumf>, %26, %cst_12 [2] : vector<4x24x24xf32> to vector<4x24xf32>
    %28 = vector.shape_cast %27 : vector<4x24xf32> to vector<4x24x1xf32>
    %29 = vector.broadcast %28 : vector<4x24x1xf32> to vector<4x24x24xf32>
    %30 = arith.subf %26, %29 : vector<4x24x24xf32>
    %31 = math.exp %30 : vector<4x24x24xf32>
    %cst_13 = arith.constant dense<0.000000e+00> : vector<4x24xf32>
    %32 = vector.multi_reduction <add>, %31, %cst_13 [2] : vector<4x24x24xf32> to vector<4x24xf32>
    %33 = vector.shape_cast %32 : vector<4x24xf32> to vector<4x24x1xf32>
    %34 = tpu.reciprocal %33 {approx = true} : vector<4x24x1xf32> -> vector<4x24x1xf32>
    %35 = vector.broadcast %34 : vector<4x24x1xf32> to vector<4x24x24xf32>
    %36 = arith.mulf %31, %35 : vector<4x24x24xf32>
    %37 = arith.truncf %36 : vector<4x24x24xf32> to vector<4x24x24xbf16>
    "tpu.trace_start"() <{level = 10 : i32, message = "hqk,khd->qhd"}> : () -> ()
    %cst_14 = arith.constant dense<0.000000e+00> : vector<4x8x24xf32>
    %38 = tpu.matmul %15, %37, %cst_14 {dimension_numbers = #tpu.dot_dimension_numbers<[0], [2], [2], [1], [0, 1, 0, 2, 1, 1], [1], [0]>} : vector<24x4x8xbf16>, vector<4x24x24xbf16>, vector<4x8x24xf32> -> vector<4x8x24xf32>
    %39 = tpu.transpose %38, [2, 0, 1] : vector<4x8x24xf32> -> vector<24x4x8xf32>
    "tpu.trace_stop"() : () -> ()
    %40 = vector.shape_cast %39 : vector<24x4x8xf32> to vector<24x32xf32>
    %41 = arith.truncf %40 : vector<24x32xf32> to vector<24x32xbf16>
    %c0_15 = arith.constant 0 : index
    %c0_16 = arith.constant 0 : index
    %42 = vector.load %arg7[%c0_15, %c0_16] : memref<32x32xbf16, #tpu.memory_space<vmem>>, vector<32x32xbf16>
    %cst_17 = arith.constant dense<0.000000e+00> : vector<24x32xf32>
    %43 = tpu.matmul %41, %42, %cst_17 {dimension_numbers = #tpu.dot_dimension_numbers<[1], [0], [0], [1], [0, 0, 1, 1], [], []>} : vector<24x32xbf16>, vector<32x32xbf16>, vector<24x32xf32> -> vector<24x32xf32>
    %c0_18 = arith.constant 0 : index
    %c0_19 = arith.constant 0 : index
    %44 = vector.load %arg8[%c0_18, %c0_19] : memref<1x32xf32, #tpu.memory_space<vmem>>, vector<1x32xf32>
    %45 = vector.broadcast %44 : vector<1x32xf32> to vector<24x32xf32>
    %46 = arith.addf %43, %45 : vector<24x32xf32>
    %47 = arith.addf %8, %46 : vector<24x32xf32>
    %c0_20 = arith.constant 0 : index
    %c0_21 = arith.constant 0 : index
    %48 = vector.load %arg9[%c0_20, %c0_21] : memref<1x32xf32, #tpu.memory_space<vmem>>, vector<1x32xf32>
    %c0_22 = arith.constant 0 : index
    %c0_23 = arith.constant 0 : index
    %49 = vector.load %arg10[%c0_22, %c0_23] : memref<1x32xf32, #tpu.memory_space<vmem>>, vector<1x32xf32>
    %cst_24 = arith.constant dense<0.000000e+00> : vector<24xf32>
    %50 = vector.multi_reduction <add>, %47, %cst_24 [1] : vector<24x32xf32> to vector<24xf32>
    %51 = vector.shape_cast %50 : vector<24xf32> to vector<24x1xf32>
    %cst_25 = arith.constant 3.200000e+01 : f32
    %52 = vector.broadcast %cst_25 : f32 to vector<24x1xf32>
    %53 = arith.divf %51, %52 : vector<24x1xf32>
    %54 = vector.broadcast %53 : vector<24x1xf32> to vector<24x32xf32>
    %55 = arith.subf %47, %54 : vector<24x32xf32>
    %56 = arith.mulf %55, %55 : vector<24x32xf32>
    %cst_26 = arith.constant dense<0.000000e+00> : vector<24xf32>
    %57 = vector.multi_reduction <add>, %56, %cst_26 [1] : vector<24x32xf32> to vector<24xf32>
    %58 = vector.shape_cast %57 : vector<24xf32> to vector<24x1xf32>
    %cst_27 = arith.constant 3.200000e+01 : f32
    %59 = vector.broadcast %cst_27 : f32 to vector<24x1xf32>
    %60 = arith.divf %58, %59 : vector<24x1xf32>
    %61 = vector.broadcast %53 : vector<24x1xf32> to vector<24x32xf32>
    %62 = arith.subf %47, %61 : vector<24x32xf32>
    %cst_28 = arith.constant 9.99999974E-6 : f32
    %63 = vector.broadcast %cst_28 : f32 to vector<24x1xf32>
    %64 = arith.addf %60, %63 : vector<24x1xf32>
    %65 = math.rsqrt %64 : vector<24x1xf32>
    %66 = vector.broadcast %65 : vector<24x1xf32> to vector<24x32xf32>
    %67 = arith.mulf %62, %66 : vector<24x32xf32>
    %68 = vector.broadcast %48 : vector<1x32xf32> to vector<24x32xf32>
    %69 = arith.mulf %67, %68 : vector<24x32xf32>
    %70 = vector.broadcast %49 : vector<1x32xf32> to vector<24x32xf32>
    %71 = arith.addf %69, %70 : vector<24x32xf32>
    %72 = arith.truncf %71 : vector<24x32xf32> to vector<24x32xbf16>
    %c0_29 = arith.constant 0 : index
    %c0_30 = arith.constant 0 : index
    %73 = vector.load %arg11[%c0_29, %c0_30] : memref<32x128xbf16, #tpu.memory_space<vmem>>, vector<32x128xbf16>
    %cst_31 = arith.constant dense<0.000000e+00> : vector<24x128xf32>
    %74 = tpu.matmul %72, %73, %cst_31 {dimension_numbers = #tpu.dot_dimension_numbers<[1], [0], [0], [1], [0, 0, 1, 1], [], []>} : vector<24x32xbf16>, vector<32x128xbf16>, vector<24x128xf32> -> vector<24x128xf32>
    %c0_32 = arith.constant 0 : index
    %c0_33 = arith.constant 0 : index
    %75 = vector.load %arg12[%c0_32, %c0_33] : memref<1x128xf32, #tpu.memory_space<vmem>>, vector<1x128xf32>
    %76 = vector.broadcast %75 : vector<1x128xf32> to vector<24x128xf32>
    %77 = arith.addf %74, %76 : vector<24x128xf32>
    %cst_34 = arith.constant 1.702000e+00 : f32
    %78 = vector.broadcast %cst_34 : f32 to vector<24x128xf32>
    %79 = arith.mulf %78, %77 : vector<24x128xf32>
    %80 = arith.negf %79 : vector<24x128xf32>
    %81 = math.exp %80 : vector<24x128xf32>
    %cst_35 = arith.constant 1.000000e+00 : f32
    %82 = vector.broadcast %cst_35 : f32 to vector<24x128xf32>
    %83 = arith.addf %82, %81 : vector<24x128xf32>
    %84 = arith.divf %82, %83 : vector<24x128xf32>
    %85 = arith.mulf %77, %84 : vector<24x128xf32>
    %86 = arith.truncf %85 : vector<24x128xf32> to vector<24x128xbf16>
    %c0_36 = arith.constant 0 : index
    %c0_37 = arith.constant 0 : index
    %87 = vector.load %arg13[%c0_36, %c0_37] : memref<128x32xbf16, #tpu.memory_space<vmem>>, vector<128x32xbf16>
    %cst_38 = arith.constant dense<0.000000e+00> : vector<24x32xf32>
    %88 = tpu.matmul %86, %87, %cst_38 {dimension_numbers = #tpu.dot_dimension_numbers<[1], [0], [0], [1], [0, 0, 1, 1], [], []>} : vector<24x128xbf16>, vector<128x32xbf16>, vector<24x32xf32> -> vector<24x32xf32>
    %c0_39 = arith.constant 0 : index
    %c0_40 = arith.constant 0 : index
    %89 = vector.load %arg14[%c0_39, %c0_40] : memref<1x32xf32, #tpu.memory_space<vmem>>, vector<1x32xf32>
    %90 = vector.broadcast %89 : vector<1x32xf32> to vector<24x32xf32>
    %91 = arith.addf %88, %90 : vector<24x32xf32>
    %92 = arith.addf %47, %91 : vector<24x32xf32>
    %c0_41 = arith.constant 0 : index
    %c0_42 = arith.constant 0 : index
    %c0_43 = arith.constant 0 : index
    %93 = vector.load %arg15[%c0_41, %c0_42, %c0_43] : memref<1x24x32xf32, #tpu.memory_space<vmem>>, vector<1x24x32xf32>
    %94 = vector.shape_cast %93 : vector<1x24x32xf32> to vector<24x32xf32>
    %95 = vector.shape_cast %92 : vector<24x32xf32> to vector<1x24x32xf32>
    tpu.vector_store %arg15[%c0_41, %c0_42, %c0_43], %95 {strides = array<i32>} : memref<1x24x32xf32, #tpu.memory_space<vmem>>, vector<1x24x32xf32>,
    return
  }
  func.func @transform_0(%arg0: i32, %arg1: i32) -> (i32, i32, i32) {
    %c0_i32 = arith.constant 0 : i32
    %c0_i32_0 = arith.constant 0 : i32
    %c0_i32_1 = arith.constant 0 : i32
    return %arg0, %c0_i32, %c0_i32_0 : i32, i32, i32
  }
  func.func @transform_1(%arg0: i32, %arg1: i32) -> (i32, i32) {
    %c0_i32 = arith.constant 0 : i32
    %c0_i32_0 = arith.constant 0 : i32
    %c0_i32_1 = arith.constant 0 : i32
    return %c0_i32, %c0_i32_0 : i32, i32
  }
  func.func @transform_2(%arg0: i32, %arg1: i32) -> (i32, i32) {
    %c0_i32 = arith.constant 0 : i32
    %c0_i32_0 = arith.constant 0 : i32
    %c0_i32_1 = arith.constant 0 : i32
    return %c0_i32, %c0_i32_0 : i32, i32
  }
  func.func @transform_3(%arg0: i32, %arg1: i32) -> (i32, i32) {
    %c0_i32 = arith.constant 0 : i32
    %c0_i32_0 = arith.constant 0 : i32
    %c0_i32_1 = arith.constant 0 : i32
    return %c0_i32, %c0_i32_0 : i32, i32
  }
  func.func @transform_4(%arg0: i32, %arg1: i32) -> (i32, i32) {
    %c0_i32 = arith.constant 0 : i32
    %c0_i32_0 = arith.constant 0 : i32
    %c0_i32_1 = arith.constant 0 : i32
    return %c0_i32, %c0_i32_0 : i32, i32
  }
  func.func @transform_5(%arg0: i32, %arg1: i32) -> (i32, i32) {
    %c0_i32 = arith.constant 0 : i32
    %c0_i32_0 = arith.constant 0 : i32
    %c0_i32_1 = arith.constant 0 : i32
    return %c0_i32, %c0_i32_0 : i32, i32
  }
  func.func @transform_6(%arg0: i32, %arg1: i32) -> (i32, i32) {
    %c0_i32 = arith.constant 0 : i32
    %c0_i32_0 = arith.constant 0 : i32
    %c0_i32_1 = arith.constant 0 : i32
    return %c0_i32, %c0_i32_0 : i32, i32
  }
  func.func @transform_7(%arg0: i32, %arg1: i32) -> (i32, i32) {
    %c0_i32 = arith.constant 0 : i32
    %c0_i32_0 = arith.constant 0 : i32
    %c0_i32_1 = arith.constant 0 : i32
    return %c0_i32, %c0_i32_0 : i32, i32
  }
  func.func @transform_8(%arg0: i32, %arg1: i32) -> (i32, i32) {
    %c0_i32 = arith.constant 0 : i32
    %c0_i32_0 = arith.constant 0 : i32
    %c0_i32_1 = arith.constant 0 : i32
    return %c0_i32, %c0_i32_0 : i32, i32
  }
  func.func @transform_9(%arg0: i32, %arg1: i32) -> (i32, i32) {
    %c0_i32 = arith.constant 0 : i32
    %c0_i32_0 = arith.constant 0 : i32
    %c0_i32_1 = arith.constant 0 : i32
    return %c0_i32, %c0_i32_0 : i32, i32
  }
  func.func @transform_10(%arg0: i32, %arg1: i32) -> (i32, i32) {
    %c0_i32 = arith.constant 0 : i32
    %c0_i32_0 = arith.constant 0 : i32
    %c0_i32_1 = arith.constant 0 : i32
    return %c0_i32, %c0_i32_0 : i32, i32
  }
  func.func @transform_11(%arg0: i32, %arg1: i32) -> (i32, i32) {
    %c0_i32 = arith.constant 0 : i32
    %c0_i32_0 = arith.constant 0 : i32
    %c0_i32_1 = arith.constant 0 : i32
    return %c0_i32, %c0_i32_0 : i32, i32
  }
  func.func @transform_12(%arg0: i32, %arg1: i32) -> (i32, i32) {
    %c0_i32 = arith.constant 0 : i32
    %c0_i32_0 = arith.constant 0 : i32
    %c0_i32_1 = arith.constant 0 : i32
    return %c0_i32, %c0_i32_0 : i32, i32
  }
  func.func @transform_13(%arg0: i32, %arg1: i32) -> (i32, i32, i32) {
    %c0_i32 = arith.constant 0 : i32
    %c0_i32_0 = arith.constant 0 : i32
    return %arg0, %arg1, %c0_i32 : i32, i32, i32
  }
}

</mosaic_0001>

<bundles_post_ra>
// kernel: tpu_custom_call.1
= control target key start
LH: loop header
LB: loop body
LE: loop exit
PB: predicated region body
PF: predicated region fallthrough
CT: control target
= control target key end

     0   :  { %6 = vsyncpa [#allocation3], 0  ;;  %s305_s0 = inlined_call_operand.hbm [shape: f32[8,128], index: 0, kind: input, shape index: {}]   ;;  %s306_s1 = inlined_call_operand.hbm [shape: f32[8,128], index: 1, kind: output, shape index: {}]  }
   0x1   :  { %7 = vsyncpa [#allocation4], 0  ;;  %s258_s6 = smov 0  }
   0x2 LB: > { %s145_s7 = sadd.s32 4294967295, %s244_s6   ;;  %p146_p0 = scmp.ge.s32.totalorder %s244_s6, 1  ;;  %s244_s6 = sphi %s258_s6, %s13_s6  }
   0x3   : > { %p60_p1 = scmp.lt.s32.totalorder %s244_s6, 3  ;;  %p270_p3 = scmp.eq.s32.totalorder %s145_s7, 0 }
   0x4   : > { %s246_s10 = smov [#allocation2]  }
   0x5   : > { %p266_p2 = pnand %p146_p0, %p60_p1  ;;  %s73_s11 = sshll.u32 %s246_s10, 4  ;;  %s74_s11 = int_to_ptr.vmem [resolvable:$true] %s73_s11 }
   0x6   : > { %s191_s12 = scalar_lea.vmem %s74_s11, 128  ;;  %p199_p10 = scmp.lt.s32.totalorder %s74_s11, %s74_s11 }
   0x7   : > { %p162_p4 = pneg %p266_p2  ;;  %p192_p7 = scmp.ne.s32.totalorder %s74_s11, %s191_s12 }
   0x8   : > { %p200_p11 = scmp.lt.s32.totalorder %s191_s12, %s191_s12 }
   0x9   : > { %p163_p5 = pnand %p270_p3, %p162_p4 }
   0xa   : > { %p201_p12 = por %p200_p11, %p199_p10 }
   0xb   : > { %p182_p6 = pneg %p163_p5 }
   0xd   : > { %p194_p8 = pnand %p192_p7, %p182_p6 }
   0xf   : > { %p195_p9 = pneg %p194_p8 }
  0x11   : > { %p202_p13 = pnand %p201_p12, %p195_p9 }
  0x13   : > { %205 = shalt.err (!%p202_p13)
}
  0x14   : > { %165 = dma.hbm_to_vmem [thread:$0]  (!%p163_p5), %s305_s0, 128, %s74_s11, [#allocation3]  }
  0x15   : > { %86 = sbr.rel (%p266_p2) target bundleno = 42 (0x2a), region = 24 }
  0x1a   : > { %235 = dma.done.wait (%p270_p3), [#allocation3], 128  }
  0x1b   : > { %237 = vsyncadd (%p270_p3), [#allocation3], 4294967168  ;;  %s247_s15 = smov [#allocation5]   ;;  %v96_v0 = vld [vmem:[#allocation2] sm:$0xff]  ;;  %p287_p0 = scmp.eq.s32.totalorder %s145_s7, 1 }
  0x1c   : > { %s106_s16 = sshll.u32 %s247_s15, 4  ;;  %v97_v1 = vadd.f32 1.0, %v96_v0  ;;  %s107_s16 = int_to_ptr.vmem [resolvable:$true] %s106_s16 }
  0x1d   : > { %s206_s18 = scalar_lea.vmem %s107_s16, 128  ;;  %p213_p5 = scmp.lt.s32.totalorder %s107_s16, %s107_s16 }
  0x1e   : > { %98 = vst [vmem:[#allocation5] sm:$0xff] %v97_v1  ;;  %p207_p1 = scmp.ne.s32.totalorder %s107_s16, %s206_s18  ;;  %p214_p6 = scmp.lt.s32.totalorder %s206_s18, %s206_s18 }
  0x20   : > { %p208_p2 = pnand %p207_p1, %p287_p0  ;;  %p215_p7 = por %p214_p6, %p213_p5 }
  0x22   : > { %p209_p4 = pneg %p208_p2 }
  0x24   : > { %p216_p3 = pnand %p215_p7, %p209_p4 }
  0x26   : > { %219 = shalt.err (!%p216_p3)
}
  0x27   : > { %159 = dma.vmem_to_hbm [thread:$0]  (%p287_p0), %s107_s16, 128, %s306_s1, [#allocation4]  }
  0x28   : > { %239 = dma.done.wait (%p287_p0), [#allocation4], 128  }
  0x29   : > { %241 = vsyncadd (%p287_p0), [#allocation4], 4294967168 }
  0x2a PF: > { %s13_s6 = sadd.s32 1, %s244_s6  }
  0x2b   : > { %p10_p8 = scmp.ge.s32.totalorder %s13_s6, 4  }
  0x2d   :  { %12 = sbr.rel (!%p10_p8) target bundleno = 2 (0x2), region = 53 }
  0x32   :  { %119 = vsyncpa [#allocation3], 1 }
  0x33   :  { %121 = vsyncpa [#allocation3 + $0x1], 1 }
  0x34   :  { %122 = vsyncpa [#allocation4], 1 }
  0x35   :  { %124 = vsyncpa [#allocation4 + $0x1], 1 }

// kernel: vit_forward.6
= control target key start
LH: loop header
LB: loop body
LE: loop exit
PB: predicated region body
PF: predicated region fallthrough
CT: control target
= control target key end

     0   :  { %vm19_vm0 = vcmask 261120   ;;  %s202_s0 = inlined_call_operand.vmem [shape: f32[40,32], index: 0, kind: input, shape index: {}]   ;;  %s203_s1 = inlined_call_operand.vmem [shape: f32[1,32], index: 1, kind: input, shape index: {}]   ;;  %s204_s2 = inlined_call_operand.vmem [shape: f32[1,32], index: 2, kind: input, shape index: {}]   ;;  %s205_s3 = inlined_call_operand.vmem [shape: f32[40,32], index: 3, kind: output, shape index: {}]  }
   0x1   :  { %v14_v0 = vld [vmem:[%s202_s0] sm:$0xff]  ;;  %v16_v1 = vld [vmem:[%s202_s0 + $0x10] sm:$0xff]  ;;  %v15_v2 = vld [vmem:[%s202_s0 + $0x8] sm:$0xff] }
   0x2   :  { %v20_v3 = vsel %vm19_vm0, %v14_v0, 0.0  ;;  %v26_v4 = vsel %vm19_vm0, %v16_v1, 0.0  ;;  %v17_v5 = vld [vmem:[%s202_s0 + $0x18] sm:$0xff]  ;;  %v23_v6 = vsel %vm19_vm0, %v15_v2, 0.0  ;;  %v18_v8 = vld [vmem:[%s202_s0 + $0x20] sm:$0xff] }
   0x3   :  { %21 = vadd.xlane.f32.xlu0 %v20_v3  ;;  %27 = vadd.xlane.f32.xlu1 %v26_v4  ;;  %v29_v7 = vsel %vm19_vm0, %v17_v5, 0.0  ;;  %v32_v9 = vsel %vm19_vm0, %v18_v8, 0.0  ;;  %v119_v51 = vld [vmem:[%s203_s1] ss:$0 sm:$0xff] }
   0x4   :  { %v120_v53 = vld [vmem:[%s204_s2] ss:$0 sm:$0xff] }
   0x7   :  { %24 = vadd.xlane.f32.xlu0 %v23_v6  ;;  %30 = vadd.xlane.f32.xlu1 %v29_v7 }
   0xb   :  { %33 = vadd.xlane.f32.xlu0 %v32_v9 }
  0x8c   :  { %v22_v10 = vpop.xlane.xlu0 %21  ;;  %v28_v11 = vpop.xlane.xlu1 %27 }
  0x8d   :  { %v36_v12 = vmul.f32 0.03125, %v22_v10  ;;  %v38_v13 = vmul.f32 0.03125, %v28_v11 }
  0x8f   :  { %v41_v14 = vsub.f32 %v14_v0, %v36_v12  ;;  %v43_v15 = vsub.f32 %v16_v1, %v38_v13 }
  0x90   :  { %v25_v16 = vpop.xlane.xlu0 %24  ;;  %v31_v17 = vpop.xlane.xlu1 %30 }
  0x91   :  { %v37_v18 = vmul.f32 0.03125, %v25_v16  ;;  %v39_v19 = vmul.f32 0.03125, %v31_v17  ;;  %v46_v20 = vmul.f32 %v41_v14, %v41_v14  ;;  %v48_v21 = vmul.f32 %v43_v15, %v43_v15 }
  0x93   :  { %v42_v22 = vsub.f32 %v15_v2, %v37_v18  ;;  %v44_v23 = vsub.f32 %v17_v5, %v39_v19  ;;  %v51_v24 = vsel %vm19_vm0, %v46_v20, 0.0  ;;  %v57_v27 = vsel %vm19_vm0, %v48_v21, 0.0 }
  0x94   :  { %52 = vadd.xlane.f32.xlu1 %v51_v24  ;;  %v34_v25 = vpop.xlane.xlu0 %33 }
  0x95   :  { %v40_v26 = vmul.f32 0.03125, %v34_v25  ;;  %v47_v28 = vmul.f32 %v42_v22, %v42_v22  ;;  %v49_v29 = vmul.f32 %v44_v23, %v44_v23 }
  0x97   :  { %v45_v30 = vsub.f32 %v18_v8, %v40_v26  ;;  %v54_v31 = vsel %vm19_vm0, %v47_v28, 0.0  ;;  %v60_v32 = vsel %vm19_vm0, %v49_v29, 0.0 }
  0x98   :  { %58 = vadd.xlane.f32.xlu1 %v57_v27  ;;  %55 = vadd.xlane.f32.xlu0 %v54_v31 }
  0x99   :  { %v50_v33 = vmul.f32 %v45_v30, %v45_v30 }
  0x9b   :  { %v63_v34 = vsel %vm19_vm0, %v50_v33, 0.0 }
  0x9c   :  { %61 = vadd.xlane.f32.xlu0 %v60_v32  ;;  %64 = vadd.xlane.f32.xlu1 %v63_v34 }
 0x11d   :  { %v53_v35 = vpop.xlane.xlu1 %52 }
 0x11e   :  { %v66_v36 = vmul.f32 0.03125, %v53_v35 }
 0x120   :  { %v71_v37 = vadd.f32 1e-05, %v66_v36 }
 0x121   :  { %v59_v38 = vpop.xlane.xlu1 %58  ;;  %v56_v39 = vpop.xlane.xlu0 %55 }
 0x122   :  { %121 = vrsqrt.f32 %v71_v37  ;;  %v68_v40 = vmul.f32 0.03125, %v59_v38  ;;  %v67_v41 = vmul.f32 0.03125, %v56_v39 }
 0x124   :  { %v73_v42 = vadd.f32 1e-05, %v68_v40  ;;  %v72_v43 = vadd.f32 1e-05, %v67_v41 }
 0x125   :  { %v65_v44 = vpop.xlane.xlu1 %64  ;;  %v62_v45 = vpop.xlane.xlu0 %61 }
 0x126   :  { %123 = vrsqrt.f32 %v73_v42  ;;  %v70_v46 = vmul.f32 0.03125, %v65_v44  ;;  %v69_v47 = vmul.f32 0.03125, %v62_v45 }
 0x127   :  { %125 = vrsqrt.f32 %v72_v43 }
 0x128   :  { %v75_v48 = vadd.f32 1e-05, %v70_v46  ;;  %v74_v49 = vadd.f32 1e-05, %v69_v47 }
 0x12a   :  { %127 = vrsqrt.f32 %v75_v48 }
 0x12b   :  { %129 = vrsqrt.f32 %v74_v49 }
 0x12f   :  { %v122_v50 = vpop.eup %121 }
 0x130   :  { %v81_v52 = vmul.f32 %v122_v50, %v41_v14 }
 0x132   :  { %v93_v54 = vmul.f32 %v119_v51, %v81_v52 }
 0x133   :  { %v124_v55 = vpop.eup %123 }
 0x134   :  { %v126_v56 = vpop.eup %125  ;;  %v105_v57 = vadd.f32 %v120_v53, %v93_v54  ;;  %v83_v58 = vmul.f32 %v124_v55, %v43_v15 }
 0x135   :  { %v82_v59 = vmul.f32 %v126_v56, %v42_v22 }
 0x136   :  { %110 = vst.msk [vmem:[%s205_s3] sm:$0xff] %vm19_vm0, %v105_v57  ;;  %v95_v60 = vmul.f32 %v119_v51, %v83_v58 }
 0x137   :  { %v128_v61 = vpop.eup %127  ;;  %v94_v62 = vmul.f32 %v119_v51, %v82_v59 }
 0x138   :  { %v130_v63 = vpop.eup %129  ;;  %v107_v0 = vadd.f32 %v120_v53, %v95_v60  ;;  %v85_v1 = vmul.f32 %v128_v61, %v45_v30 }
 0x139   :  { %v106_v2 = vadd.f32 %v120_v53, %v94_v62  ;;  %v84_v3 = vmul.f32 %v130_v63, %v44_v23 }
 0x13a   :  { %112 = vst.msk [vmem:[%s205_s3 + $0x10] sm:$0xff] %vm19_vm0, %v107_v0  ;;  %v97_v4 = vmul.f32 %v119_v51, %v85_v1 }
 0x13b   :  { %111 = vst.msk [vmem:[%s205_s3 + $0x8] sm:$0xff] %vm19_vm0, %v106_v2  ;;  %v96_v5 = vmul.f32 %v119_v51, %v84_v3 }
 0x13c   :  { %v109_v6 = vadd.f32 %v120_v53, %v97_v4 }
 0x13d   :  { %v108_v7 = vadd.f32 %v120_v53, %v96_v5 }
 0x13e   :  { %114 = vst.msk [vmem:[%s205_s3 + $0x20] sm:$0xff] %vm19_vm0, %v109_v6 }
 0x13f   :  { %113 = vst.msk [vmem:[%s205_s3 + $0x18] sm:$0xff] %vm19_vm0, %v108_v7 }

// kernel: vit_forward.5
= control target key start
LH: loop header
LB: loop body
LE: loop exit
PB: predicated region body
PF: predicated region fallthrough
CT: control target
= control target key end

     0   :  { %s411_s1 = inlined_call_operand.vmem [shape: bf16[256,128], index: 1, kind: input, shape index: {}]   ;;  %s412_s0 = inlined_call_operand.vmem [shape: bf16[32,256], index: 0, kind: input, shape index: {}]   ;;  %s413_s2 = inlined_call_operand.vmem [shape: f32[32,128], index: 2, kind: output, shape index: {}]  }
   0x1   :  { %v302_v0 = vld [vmem:[%s411_s1 + $0x78] sm:$0xff]   ;;  %v304_v2 = vld [vmem:[%s411_s1 + $0x70] sm:$0xff]   ;;  %v306_v4 = vld [vmem:[%s411_s1 + $0x68] sm:$0xff]  }
   0x2   :  { %v303_v1 = vld [vmem:[%s411_s1 + $0x38] sm:$0xff]   ;;  %257 = vmatprep.subr.bf16.mxu0 %v302_v0  ;;  %285 = vmatprep.subr.bf16.mxu1 %v302_v0  ;;  %v305_v3 = vld [vmem:[%s411_s1 + $0x30] sm:$0xff]   ;;  %v307_v5 = vld [vmem:[%s411_s1 + $0x28] sm:$0xff]  }
   0x3   :  { %258 = vmatpush3.bf16.msra.mxu0 %v303_v1  ;;  %293 = vmatpush3.bf16.msra.mxu1 %v303_v1  ;;  %v308_v6 = vld [vmem:[%s411_s1 + $0x60] sm:$0xff]   ;;  %v310_v8 = vld [vmem:[%s411_s1 + $0x58] sm:$0xff]   ;;  %v312_v10 = vld [vmem:[%s411_s1 + $0x50] sm:$0xff]  }
   0x4   :  { %259 = vmatprep.subr.bf16.mxu0 %v304_v2  ;;  %286 = vmatprep.subr.bf16.mxu1 %v304_v2  ;;  %v309_v7 = vld [vmem:[%s411_s1 + $0x20] sm:$0xff]   ;;  %v311_v9 = vld [vmem:[%s411_s1 + $0x18] sm:$0xff]   ;;  %v313_v13 = vld [vmem:[%s411_s1 + $0x10] sm:$0xff]  }
   0x5   :  { %v320_v11 = vld [vmem:[%s412_s0 + $0x4] ss:$8 sps:$4 sm:$0xff]   ;;  %v323_v12 = vld [vmem:[%s412_s0 + $0x14] ss:$8 sps:$4 sm:$0xff]   ;;  %v318_v18 = vld [vmem:[%s412_s0] ss:$8 sps:$4 sm:$0xff]  }
   0x6   :  { %v314_v14 = vld [vmem:[%s411_s1 + $0x48] sm:$0xff]   ;;  %208 = vmatprep.mubr.bf16.mxu0 %v320_v11  ;;  %216 = vmatprep.mubr.bf16.mxu1 %v323_v12  ;;  %v316_v16 = vld [vmem:[%s411_s1 + $0x40] sm:$0xff]   ;;  %v321_v19 = vld [vmem:[%s412_s0 + $0x10] ss:$8 sps:$4 sm:$0xff]  }
   0x7   :  { %260 = vmatpush3.bf16.msra.mxu0 %v305_v3  ;;  %294 = vmatpush3.bf16.msra.mxu1 %v305_v3  ;;  %v315_v15 = vld [vmem:[%s411_s1 + $0x8] sm:$0xff]   ;;  %v317_v17 = vld [vmem:[%s411_s1] sm:$0xff]  }
   0x8   :  { %261 = vmatprep.subr.bf16.mxu0 %v306_v4  ;;  %287 = vmatprep.subr.bf16.mxu1 %v306_v4 }
   0xb   :  { %262 = vmatpush3.bf16.msra.mxu0 %v307_v5  ;;  %295 = vmatpush3.bf16.msra.mxu1 %v307_v5 }
   0xc   :  { %263 = vmatprep.subr.bf16.mxu0 %v308_v6  ;;  %288 = vmatprep.subr.bf16.mxu1 %v308_v6 }
   0xf   :  { %264 = vmatpush3.bf16.msra.mxu0 %v309_v7  ;;  %296 = vmatpush3.bf16.msra.mxu1 %v309_v7 }
  0x10   :  { %265 = vmatprep.subr.bf16.mxu0 %v310_v8  ;;  %289 = vmatprep.subr.bf16.mxu1 %v310_v8 }
  0x13   :  { %266 = vmatpush3.bf16.msra.mxu0 %v311_v9  ;;  %297 = vmatpush3.bf16.msra.mxu1 %v311_v9 }
  0x14   :  { %267 = vmatprep.subr.bf16.mxu0 %v312_v10  ;;  %290 = vmatprep.subr.bf16.mxu1 %v312_v10 }
  0x17   :  { %268 = vmatpush3.bf16.msra.mxu0 %v313_v13  ;;  %298 = vmatpush3.bf16.msra.mxu1 %v313_v13 }
  0x18   :  { %269 = vmatprep.subr.bf16.mxu0 %v314_v14  ;;  %291 = vmatprep.subr.bf16.mxu1 %v314_v14 }
  0x1b   :  { %270 = vmatpush3.bf16.msra.mxu0 %v315_v15  ;;  %299 = vmatpush3.bf16.msra.mxu1 %v315_v15 }
  0x1c   :  { %271 = vmatprep.subr.bf16.mxu0 %v316_v16  ;;  %292 = vmatprep.subr.bf16.mxu1 %v316_v16 }
  0x1f   :  { %272 = vmatpush3.bf16.msra.mxu0 %v317_v17  ;;  %300 = vmatpush3.bf16.msra.mxu1 %v317_v17 }
  0x22   :  { %209 = vmatmul.mubr.bf16.vlgmr.msra.gmra.mxu0 %v318_v18  ;;  %217 = vmatmul.mubr.bf16.vlgmr.msra.gmra.mxu1 %v321_v19 }
  0xe2   :  { %v273_v20 = vpop.f32.mrf.mxu0  ;;  %v279_v21 = vpop.f32.mrf.mxu1 }
  0xe4   :  { %v274_v22 = vpop.f32.mrf.mxu0  ;;  %v280_v23 = vpop.f32.mrf.mxu1 }
  0xe5   :  { %v275_v24 = vadd.f32 %v274_v22, %v273_v20  ;;  %v281_v25 = vadd.f32 %v280_v23, %v279_v21 }
  0xe6   :  { %v276_v26 = vpop.f32.mrf.mxu0  ;;  %v282_v27 = vpop.f32.mrf.mxu1 }
  0xe7   :  { %229 = vst [vmem:[%s413_s2] sm:$0xff] %v275_v24  ;;  %231 = vst [vmem:[%s413_s2 + $0x10] sm:$0xff] %v281_v25 }
  0xe8   :  { %v277_v28 = vpop.f32.mrf.mxu0  ;;  %v283_v29 = vpop.f32.mrf.mxu1 }
  0xe9   :  { %v278_v30 = vadd.f32 %v277_v28, %v276_v26  ;;  %v284_v31 = vadd.f32 %v283_v29, %v282_v27 }
  0xeb   :  { %230 = vst [vmem:[%s413_s2 + $0x8] sm:$0xff] %v278_v30  ;;  %232 = vst [vmem:[%s413_s2 + $0x18] sm:$0xff] %v284_v31 }

// kernel: vit_forward.9
= control target key start
LH: loop header
LB: loop body
LE: loop exit
PB: predicated region body
PF: predicated region fallthrough
CT: control target
= control target key end

     0   :  { %vm19_vm0 = vcmask 261120   ;;  %v137_v7 = vmov 0.0   ;;  %vm138_vm1 = vmmov 0   ;;  %s185_s0 = inlined_call_operand.vmem [shape: f32[8,32], index: 0, kind: input, shape index: {}]   ;;  %s186_s3 = inlined_call_operand.vmem [shape: bf16[32,128], index: 3, kind: input, shape index: {}]   ;;  %s187_s1 = inlined_call_operand.vmem [shape: f32[1,32], index: 1, kind: input, shape index: {}]   ;;  %s188_s2 = inlined_call_operand.vmem [shape: f32[1,32], index: 2, kind: input, shape index: {}]   ;;  %s189_s4 = inlined_call_operand.vmem [shape: f32[8,128], index: 4, kind: output, shape index: {}]  }
   0x1   :  { %v18_v0 = vld [vmem:[%s185_s0] sm:$0xff]  ;;  %123 = vmatprep.subr.bf16.mxu0 %v137_v7  ;;  %v133_v8 = vld [vmem:[%s186_s3 + $0x8] sm:$0xff]   ;;  %127 = vmatprep.mubr.msk.bf16.mxu0 %vm138_vm1, %v137_v7 }
   0x2   :  { %v20_v1 = vsel %vm19_vm0, %v18_v0, 0.0  ;;  %124 = vmatpush3.bf16.msra.mxu0 %v133_v8  ;;  %v134_v9 = vld [vmem:[%s186_s3] sm:$0xff]  }
   0x3   :  { %21 = vadd.xlane.f32.xlu0 %v20_v1  ;;  %125 = vmatprep.subr.bf16.mxu0 %v137_v7  ;;  %v115_v14 = vld [vmem:[%s187_s1] ss:$0 sm:$0xff] }
   0x4   :  { %v116_v16 = vld [vmem:[%s188_s2] ss:$0 sm:$0xff] }
   0x6   :  { %126 = vmatpush3.bf16.msra.mxu0 %v134_v9 }
  0x8c   :  { %v22_v2 = vpop.xlane.xlu0 %21 }
  0x8d   :  { %v24_v3 = vmul.f32 0.03125, %v22_v2 }
  0x8f   :  { %v25_v4 = vsub.f32 %v18_v0, %v24_v3 }
  0x91   :  { %v26_v5 = vmul.f32 %v25_v4, %v25_v4 }
  0x93   :  { %v27_v6 = vsel %vm19_vm0, %v26_v5, 0.0 }
  0x94   :  { %28 = vadd.xlane.f32.xlu0 %v27_v6 }
 0x11d   :  { %v29_v10 = vpop.xlane.xlu0 %28 }
 0x11e   :  { %v30_v11 = vmul.f32 0.03125, %v29_v10 }
 0x120   :  { %v31_v12 = vadd.f32 1e-05, %v30_v11 }
 0x122   :  { %135 = vrsqrt.f32 %v31_v12 }
 0x12f   :  { %v136_v13 = vpop.eup %135 }
 0x130   :  { %v33_v15 = vmul.f32 %v136_v13, %v25_v4 }
 0x132   :  { %v41_v17 = vmul.f32 %v115_v14, %v33_v15 }
 0x134   :  { %v49_v18 = vadd.f32 %v116_v16, %v41_v17 }
 0x136   :  { %v50_v19 = vpack.c.bf16 %v49_v18, %v49_v18 }
 0x138   :  { %128 = vmatmul.mubr.msk.bf16.vlgmr.msra.gmra.mxu0 %vm19_vm0, %v50_v19 }
 0x1f8   :  { %v104_v20 = vpop.f32.mrf.mxu0 }
 0x1f9   :  { %110 = vst [vmem:[%s189_s4] sm:$0xff] %v104_v20 }
 0x1fa   :  { %v129_v21 = vpop.f32.mrf.mxu0 }
 0x1fc   :  { %v107_v22 = vpop.f32.mrf.mxu0 }
 0x1fe   :  { %v130_v23 = vpop.f32.mrf.mxu0 }

// kernel: vit_forward.7
= control target key start
LH: loop header
LB: loop body
LE: loop exit
PB: predicated region body
PF: predicated region fallthrough
CT: control target
= control target key end

     0   :  { %s3064_s25 = smov 0   ;;  %s3066_s26 = smov 0   ;;  %s3549_s0 = inlined_call_operand.vmem [shape: f32[2,24,32], index: 0, kind: input, shape index: {}]   ;;  %s3550_s1 = inlined_call_operand.vmem [shape: f32[1,32], index: 1, kind: input, shape index: {}]   ;;  %s3551_s2 = inlined_call_operand.vmem [shape: f32[1,32], index: 2, kind: input, shape index: {}]   ;;  %s3552_s3 = inlined_call_operand.vmem [shape: bf16[32,96], index: 3, kind: input, shape index: {}]   ;;  %s3553_s4 = inlined_call_operand.vmem [shape: f32[1,96], index: 4, kind: input, shape index: {}]   ;;  %s3554_s5 = inlined_call_operand.vmem [shape: bf16[32,32], index: 5, kind: input, shape index: {}]   ;;  %s3555_s6 = inlined_call_operand.vmem [shape: f32[1,32], index: 6, kind: input, shape index: {}]   ;;  %s3556_s7 = inlined_call_operand.vmem [shape: f32[1,32], index: 7, kind: input, shape index: {}]   ;;  %s3557_s8 = inlined_call_operand.vmem [shape: f32[1,32], index: 8, kind: input, shape index: {}]   ;;  %s3558_s9 = inlined_call_operand.vmem [shape: bf16[32,128], index: 9, kind: input, shape index: {}]   ;;  %s3559_s10 = inlined_call_operand.vmem [shape: f32[1,128], index: 10, kind: input, shape index: {}]   ;;  %s3560_s11 = inlined_call_operand.vmem [shape: bf16[128,32], index: 11, kind: input, shape index: {}]   ;;  %s3561_s12 = inlined_call_operand.vmem [shape: f32[1,32], index: 12, kind: input, shape index: {}]   ;;  %s3562_s13 = inlined_call_operand.vmem [shape: f32[2,24,32], index: 13, kind: output, shape index: {}]  }
   0x1   :  { %s3068_s27 = smov 0  }
   0x2 LB: > { %s35_s28 = sadd.s32 1, %s2975_s26  ;;  %p2577_p0 = scmp.ge.s32.totalorder %s2979_s27, 1  ;;  %s2979_s27 = sphi %s3068_s27, %s23_s27   ;;  %s2975_s26 = sphi %s3066_s26, %s3564_s26   ;;  %s2971_s25 = sphi %s3064_s25, %s3563_s25  }
   0x3   : > { %p37_p1 = scmp.ge.s32.totalorder %s35_s28, 2  ;;  %p401_p2 = scmp.lt.s32.totalorder %s2979_s27, 3 }
   0x5   : > { %s3566_s28 = smov (%p37_p1, %s35_s28), 0  ;;  %p402_p3 = pnand %p2577_p0, %p401_p2 }
   0x6   : > { %p449_p4 = scmp.lt.s32.totalorder (!%p402_p3), %s2971_s25, 1  ;;  %s2981_s14 = smov (!%p402_p3), 96  }
   0x7   : > { %405 = sbr.rel (%p402_p3) target bundleno = 2938 (0xb7a), region = 72  ;;  %s2982_s16 = smov (!%p402_p3), 120  }
   0x8   : > { %s2983_s17 = smov (!%p402_p3), 112   ;;  %s2984_s18 = smov (!%p402_p3), 104  }
   0x9   : > { %s2985_s19 = smov (!%p402_p3), 64   ;;  %s2991_s22 = smov (!%p402_p3), 16  }
   0xa   : > { %s2992_s30 = smov (!%p402_p3), 8  }
   0xc   : > { %s3568_s25 = smov (!%p449_p4, %s2971_s25), 1  ;;  %vm474_vm0 = vcmask 261120   ;;  %v2865_v21 = vld [vmem:[%s3552_s3 + $0x8] sm:$0xff]   ;;  %v2866_v22 = vld [vmem:[%s3552_s3] sm:$0xff]   ;;  %vm625_vm1 = vcmask 257024   ;;  %vm831_vm2 = vcmask 64512  }
   0xd   : > { %s2811_s29 = smul.u32 24, %s3568_s25  ;;  %2707 = vmatprep.subr.bf16.mxu1 %v2865_v21  ;;  %v2580_v34 = vld [vmem:[%s3550_s1] ss:$0 sm:$0xff]  ;;  %vm838_vm3 = vcmask 1043456   ;;  %vm1104_vm5 = vcmask 195584   ;;  %vm2988_vm6 = vmmov 0  }
   0xe   : > { %2708 = vmatpush3.bf16.msra.mxu1 %v2865_v21  ;;  %v2581_v40 = vld [vmem:[%s3551_s2] ss:$0 sm:$0xff]  ;;  %vm2108_vm7 = vcmask 130048  }
   0xf   : > { %s3090_s15 = scalar_lea.vmem %s3549_s0, %s2811_s29  ;;  %2709 = vmatprep.subr.bf16.mxu1 %v2866_v22  ;;  %v2582_v48 = vld [vmem:[%s3553_s4] ss:$0 sm:$0xff]  ;;  %s462_s23 = scalar_lea.vmem %s3562_s13, %s2811_s29 }
  0x10   : > { %v469_v0 = vld [vmem:[%s3090_s15] sm:$0xff]  ;;  %v471_v1 = vld [vmem:[%s3090_s15 + $0x10] sm:$0xff]  ;;  %v470_v2 = vld [vmem:[%s3090_s15 + $0x8] sm:$0xff] }
  0x11   : > { %v475_v3 = vsel %vm474_vm0, %v469_v0, 0.0  ;;  %v481_v4 = vsel %vm474_vm0, %v471_v1, 0.0  ;;  %v478_v5 = vsel %vm474_vm0, %v470_v2, 0.0 }
  0x12   : > { %476 = vadd.xlane.f32.xlu0 %v475_v3  ;;  %482 = vadd.xlane.f32.xlu1 %v481_v4 }
  0x13   : > { %2710 = vmatpush3.bf16.msra.mxu1 %v2866_v22 }
  0x16   : > { %479 = vadd.xlane.f32.xlu0 %v478_v5 }
  0x9b   : > { %v477_v6 = vpop.xlane.xlu0 %476  ;;  %v483_v7 = vpop.xlane.xlu1 %482 }
  0x9c   : > { %v485_v8 = vmul.f32 0.03125, %v477_v6  ;;  %v487_v9 = vmul.f32 0.03125, %v483_v7 }
  0x9e   : > { %v488_v10 = vsub.f32 %v469_v0, %v485_v8  ;;  %v490_v11 = vsub.f32 %v471_v1, %v487_v9 }
  0x9f   : > { %v480_v12 = vpop.xlane.xlu0 %479 }
  0xa0   : > { %v486_v13 = vmul.f32 0.03125, %v480_v12  ;;  %v491_v14 = vmul.f32 %v488_v10, %v488_v10  ;;  %v493_v15 = vmul.f32 %v490_v11, %v490_v11 }
  0xa2   : > { %v489_v16 = vsub.f32 %v470_v2, %v486_v13  ;;  %v494_v17 = vsel %vm474_vm0, %v491_v14, 0.0  ;;  %v500_v18 = vsel %vm474_vm0, %v493_v15, 0.0 }
  0xa3   : > { %495 = vadd.xlane.f32.xlu1 %v494_v17 }
  0xa4   : > { %v492_v19 = vmul.f32 %v489_v16, %v489_v16 }
  0xa6   : > { %v497_v20 = vsel %vm474_vm0, %v492_v19, 0.0 }
  0xa7   : > { %501 = vadd.xlane.f32.xlu1 %v500_v18  ;;  %498 = vadd.xlane.f32.xlu0 %v497_v20 }
 0x12c   : > { %v496_v23 = vpop.xlane.xlu1 %495 }
 0x12d   : > { %v503_v24 = vmul.f32 0.03125, %v496_v23 }
 0x12f   : > { %v506_v25 = vadd.f32 1e-05, %v503_v24 }
 0x130   : > { %v502_v26 = vpop.xlane.xlu1 %501  ;;  %v499_v27 = vpop.xlane.xlu0 %498 }
 0x131   : > { %2885 = vrsqrt.f32 %v506_v25  ;;  %v505_v28 = vmul.f32 0.03125, %v502_v26  ;;  %v504_v29 = vmul.f32 0.03125, %v499_v27 }
 0x133   : > { %v508_v30 = vadd.f32 1e-05, %v505_v28  ;;  %v507_v31 = vadd.f32 1e-05, %v504_v29 }
 0x135   : > { %2887 = vrsqrt.f32 %v508_v30 }
 0x136   : > { %2889 = vrsqrt.f32 %v507_v31 }
 0x13e   : > { %v2886_v32 = vpop.eup %2885 }
 0x13f   : > { %v512_v33 = vmul.f32 %v2886_v32, %v488_v10 }
 0x141   : > { %v521_v39 = vmul.f32 %v2580_v34, %v512_v33 }
 0x142   : > { %v2888_v35 = vpop.eup %2887 }
 0x143   : > { %v2890_v36 = vpop.eup %2889  ;;  %v514_v37 = vmul.f32 %v2888_v35, %v490_v11  ;;  %v530_v44 = vadd.f32 %v2581_v40, %v521_v39 }
 0x144   : > { %v513_v38 = vmul.f32 %v2890_v36, %v489_v16 }
 0x145   : > { %v523_v41 = vmul.f32 %v2580_v34, %v514_v37 }
 0x146   : > { %v522_v42 = vmul.f32 %v2580_v34, %v513_v38 }
 0x147   : > { %v532_v43 = vadd.f32 %v2581_v40, %v523_v41 }
 0x148   : > { %v531_v45 = vadd.f32 %v2581_v40, %v522_v42 }
 0x149   : > { %v534_v46 = vpack.c.bf16 %v532_v43, %v532_v43 }
 0x14a   : > { %v533_v47 = vpack.c.bf16 %v531_v45, %v530_v44 }
 0x14c   : > { %2711 = vmatprep.mubr.msk.bf16.mxu1 %vm474_vm0, %v533_v47 }
 0x14d   : > { %2712 = vmatmul.mubr.msk.bf16.vlgmr.msra.gmra.mxu1 %vm474_vm0, %v534_v46 }
 0x20d   : > { %v2713_v49 = vpop.f32.mrf.mxu1 }
 0x20e   : > { %v607_v50 = vadd.f32 %v2713_v49, %v2582_v48 }
 0x20f   : > { %v598_v51 = vpop.f32.mrf.mxu1 }
 0x210   : > { %v3118_v52 = vpack.c.bf16 %v607_v50, %v607_v50  ;;  %v599_v53 = vadd.f32 %v2582_v48, %v598_v51 }
 0x211   : > { %v2714_v54 = vpop.f32.mrf.mxu1 }
 0x212   : > { %628 = vst.msk [vmem:[#allocation2 + $0x8] sm:$0xf] %vm625_vm1, %v3118_v52  ;;  %v3122_v55 = vpack.c.bf16 %v599_v53, %v599_v53 }
 0x213   : > { %v601_v56 = vpop.f32.mrf.mxu1 }
 0x214   : > { %626 = vst.msk [vmem:[#allocation2] sm:$0xf] %vm625_vm1, %v3122_v55  ;;  %v602_v57 = vadd.f32 %v2582_v48, %v601_v56  ;;  %629 = vrot.lane.b32.xlu0 %v3122_v55, %s2981_s14 }
 0x216   : > { %v3127_v58 = vpack.c.bf16 %v602_v57, %v602_v57 }
 0x218   : > { %627 = vst.msk [vmem:[#allocation2 + $0x4] sm:$0xf] %vm625_vm1, %v3127_v58  ;;  %631 = vrot.lane.b32.xlu1 %v3127_v58, %s2981_s14 }
 0x219   : > { %v664_v4 = vld [vmem:[#allocation2 + $0x8] sm:$0xf] }
 0x21a   : > { %v2599_v30 = vcombine.low %v664_v4, %v664_v4 }
 0x21b   : > { %v662_v59 = vld [vmem:[#allocation2] sm:$0xf] }
 0x21c   : > { %633 = vrot.lane.b32.xlu1 %v3118_v52, %s2981_s14  ;;  %s2993_s14 = smov 24  }
 0x21f   : > { %v663_v60 = vld [vmem:[#allocation2 + $0x4] sm:$0xf] }
 0x220   : > { %v2598_v61 = vcombine.low %v662_v59, %v663_v60 }
 0x222   : > { %2717 = vmatprep.mubr.msk.bf16.mxu1 %vm831_vm2, %v2598_v61 }
 0x286   : > { %v630_v62 = vpop.permute.xlu0 %629 }
 0x287   : > { %638 = vst.msk [vmem:[#allocation3] sm:$0xf] %vm625_vm1, %v630_v62 }
 0x28a   : > { %v632_v63 = vpop.permute.xlu1 %631 }
 0x28b   : > { %639 = vst.msk [vmem:[#allocation3 + $0x4] sm:$0xf] %vm625_vm1, %v632_v63 }
 0x28e   : > { %v634_v0 = vpop.permute.xlu1 %633  ;;  %v686_v2 = vld [vmem:[#allocation3] sm:$0xf] }
 0x28f   : > { %640 = vst.msk [vmem:[#allocation3 + $0x8] sm:$0xf] %vm625_vm1, %v634_v0 }
 0x292   : > { %v687_v3 = vld [vmem:[#allocation3 + $0x4] sm:$0xf] }
 0x293   : > { %v2590_v5 = vcombine.low %v686_v2, %v687_v3 }
 0x296   : > { %v688_v1 = vld [vmem:[#allocation3 + $0x8] sm:$0xf] }
 0x297   : > { %696 = vrot.lane.b32.xlu1 %v688_v1, %s2982_s16  ;;  %702 = vrot.lane.b32.xlu0 %v688_v1, %s2983_s17  ;;  %v2591_v6 = vcombine.low %v688_v1, %v688_v1 }
 0x29b   : > { %692 = vrot.lane.b32.xlu1 %v686_v2, %s2982_s16  ;;  %668 = vrot.lane.b32.xlu0 %v662_v59, %s2982_s16 }
 0x29f   : > { %708 = vrot.lane.b32.xlu1 %v688_v1, %s2984_s18  ;;  %698 = vrot.lane.b32.xlu0 %v686_v2, %s2983_s17 }
 0x2a3   : > { %670 = vrot.lane.b32.xlu1 %v663_v60, %s2982_s16  ;;  %704 = vrot.lane.b32.xlu0 %v686_v2, %s2984_s18 }
 0x2a7   : > { %700 = vrot.lane.b32.xlu1 %v687_v3, %s2983_s17  ;;  %694 = vrot.lane.b32.xlu0 %v687_v3, %s2982_s16 }
 0x2ab   : > { %706 = vrot.lane.b32.xlu1 %v687_v3, %s2984_s18  ;;  %672 = vrot.lane.b32.xlu0 %v664_v4, %s2982_s16 }
 0x2af   : > { %674 = vrot.lane.b32.xlu0 %v662_v59, %s2983_s17 }
 0x2b3   : > { %676 = vrot.lane.b32.xlu0 %v663_v60, %s2983_s17 }
 0x2b7   : > { %680 = vrot.lane.b32.xlu0 %v662_v59, %s2984_s18 }
 0x2bb   : > { %682 = vrot.lane.b32.xlu0 %v663_v60, %s2984_s18 }
 0x2bf   : > { %678 = vrot.lane.b32.xlu0 %v664_v4, %s2983_s17 }
 0x2c3   : > { %684 = vrot.lane.b32.xlu0 %v664_v4, %s2984_s18 }
 0x2ce   : > { %762 = vxpose.xlu1.c.b16.start [1/2] (short) (narrow) %v2590_v5, 16 }
 0x2d2   : > { %763 = vxpose.xlu1.c.b16.end [2/2] (short) (narrow) %v2591_v6, 16 }
 0x309   : > { %v697_v7 = vpop.permute.xlu1 %696  ;;  %v703_v8 = vpop.permute.xlu0 %702 }
 0x30a   : > { %v2593_v20 = vcombine.low %v697_v7, %v697_v7  ;;  %v2595_v21 = vcombine.low %v703_v8, %v703_v8 }
 0x30d   : > { %v693_v9 = vpop.permute.xlu1 %692  ;;  %v669_v10 = vpop.permute.xlu0 %668 }
 0x311   : > { %v709_v11 = vpop.permute.xlu1 %708  ;;  %v699_v12 = vpop.permute.xlu0 %698 }
 0x312   : > { %v2597_v26 = vcombine.low %v709_v11, %v709_v11 }
 0x315   : > { %v671_v13 = vpop.permute.xlu1 %670  ;;  %v705_v14 = vpop.permute.xlu0 %704 }
 0x316   : > { %v2602_v31 = vcombine.low %v669_v10, %v671_v13 }
 0x319   : > { %v701_v15 = vpop.permute.xlu1 %700  ;;  %v695_v16 = vpop.permute.xlu0 %694 }
 0x31a   : > { %v2594_v17 = vcombine.low %v699_v12, %v701_v15  ;;  %v2592_v18 = vcombine.low %v693_v9, %v695_v16 }
 0x31c   : > { %794 = vxpose.xlu1.c.b16.start [1/2] (short) (narrow) %v2594_v17, 16  ;;  %778 = vxpose.xlu0.c.b16.start [1/2] (short) (narrow) %v2592_v18, 16 }
 0x31d   : > { %v673_v19 = vpop.permute.xlu0 %672  ;;  %v707_v22 = vpop.permute.xlu1 %706 }
 0x31e   : > { %v2596_v24 = vcombine.low %v705_v14, %v707_v22  ;;  %v2603_v40 = vcombine.low %v673_v19, %v673_v19 }
 0x320   : > { %795 = vxpose.xlu1.c.b16.end [2/2] (short) (narrow) %v2595_v21, 16  ;;  %779 = vxpose.xlu0.c.b16.end [2/2] (short) (narrow) %v2593_v20, 16 }
 0x321   : > { %v675_v23 = vpop.permute.xlu0 %674 }
 0x324   : > { %810 = vxpose.xlu1.c.b16.start [1/2] (short) (narrow) %v2596_v24, 16 }
 0x325   : > { %v677_v25 = vpop.permute.xlu0 %676 }
 0x326   : > { %v2606_v27 = vcombine.low %v675_v23, %v677_v25 }
 0x328   : > { %811 = vxpose.xlu1.c.b16.end [2/2] (short) (narrow) %v2597_v26, 16  ;;  %2729 = vmatprep.mubr.msk.bf16.mxu0 %vm831_vm2, %v2606_v27 }
 0x329   : > { %643 = vrot.lane.b32.xlu0 %v3127_v58, %s2985_s19  ;;  %v681_v32 = vpop.permute.xlu0 %680 }
 0x32c   : > { %641 = vrot.lane.b32.xlu1 %v3122_v55, %s2985_s19  ;;  %v2986_v55 = vmov -1e+30  }
 0x32d   : > { %v683_v33 = vpop.permute.xlu0 %682 }
 0x32e   : > { %v2610_v42 = vcombine.low %v681_v32, %v683_v33 }
 0x330   : > { %v770_v28 = vpop.trf.xlu1  ;;  %645 = vrot.lane.b32.xlu1 %v3118_v52, %s2985_s19  ;;  %v1088_v52 = vlaneseq }
 0x331   : > { %v840_v29 = vsel %vm838_vm3, %v770_v28, 0  ;;  %2807 = vmatprep.subr.msk.bf16.mxu1 %vm838_vm3, %v770_v28  ;;  %v679_v34 = vpop.permute.xlu0 %678 }
 0x332   : > { %2716 = vmatpush3.bf16.msra.mxu1 %v840_v29  ;;  %v2607_v41 = vcombine.low %v679_v34, %v679_v34  ;;  %v1089_v53 = vand.u32 127, %v1088_v52 }
 0x334   : > { %vm1090_vm4 = vcmp.lt.s32.totalorder %v1089_v53, 17 }
 0x335   : > { %2718 = vmatmul.mubr.msk.bf16.vlgmr.msra.gmra.mxu1 %vm831_vm2, %v2599_v30  ;;  %v685_v35 = vpop.permute.xlu0 %684  ;;  %v3193_v56 = vsel %vm1090_vm4, 0.0, %v2986_v55 }
 0x336   : > { %2723 = vmatprep.mubr.msk.bf16.mxu1 %vm831_vm2, %v2602_v31  ;;  %v2611_v45 = vcombine.low %v685_v35, %v685_v35 }
 0x37e   : > { %v802_v36 = vpop.trf.xlu1  ;;  %v786_v37 = vpop.trf.xlu0 }
 0x37f   : > { %v902_v38 = vsel %vm838_vm3, %v786_v37, 0  ;;  %2808 = vmatprep.subr.msk.bf16.mxu1 %vm838_vm3, %v786_v37  ;;  %2809 = vmatprep.subr.msk.bf16.mxu0 %vm838_vm3, %v802_v36  ;;  %v964_v39 = vsel %vm838_vm3, %v802_v36, 0 }
 0x380   : > { %2722 = vmatpush3.bf16.msra.mxu1 %v902_v38  ;;  %2728 = vmatpush3.bf16.msra.mxu0 %v964_v39 }
 0x383   : > { %2724 = vmatmul.mubr.msk.bf16.vlgmr.msra.gmra.mxu1 %vm831_vm2, %v2603_v40  ;;  %2730 = vmatmul.mubr.msk.bf16.vlgmr.msra.gmra.mxu0 %vm831_vm2, %v2607_v41 }
 0x384   : > { %2735 = vmatprep.mubr.msk.bf16.mxu1 %vm831_vm2, %v2610_v42 }
 0x386   : > { %v818_v43 = vpop.trf.xlu1 }
 0x387   : > { %v1026_v44 = vsel %vm838_vm3, %v818_v43, 0  ;;  %2810 = vmatprep.subr.msk.bf16.mxu1 %vm838_vm3, %v818_v43 }
 0x388   : > { %2734 = vmatpush3.bf16.msra.mxu1 %v1026_v44 }
 0x38b   : > { %2736 = vmatmul.mubr.msk.bf16.vlgmr.msra.gmra.mxu1 %vm831_vm2, %v2611_v45 }
 0x39b   : > { %v644_v46 = vpop.permute.xlu0 %643 }
 0x39c   : > { %651 = vst.msk [vmem:[#allocation4 + $0x4] sm:$0xf] %vm625_vm1, %v644_v46 }
 0x39e   : > { %v642_v47 = vpop.permute.xlu1 %641 }
 0x39f   : > { %650 = vst.msk [vmem:[#allocation4] sm:$0xf] %vm625_vm1, %v642_v47 }
 0x3a2   : > { %v646_v48 = vpop.permute.xlu1 %645 }
 0x3a3   : > { %652 = vst.msk [vmem:[#allocation4 + $0x8] sm:$0xf] %vm625_vm1, %v646_v48  ;;  %v3176_v49 = vld [vmem:[#allocation4 + $0x4] sm:$0xf] }
 0x3a4   : > { %718 = vrot.lane.b32.xlu1 %v3176_v49, %s2982_s16 }
 0x3a6   : > { %v3180_v50 = vld [vmem:[#allocation4] sm:$0xf] }
 0x3a7   : > { %716 = vrot.lane.b32.xlu0 %v3180_v50, %s2982_s16 }
 0x3a8   : > { %722 = vrot.lane.b32.xlu1 %v3180_v50, %s2983_s17 }
 0x3aa   : > { %v3186_v51 = vld [vmem:[#allocation4 + $0x8] sm:$0xf] }
 0x3ab   : > { %720 = vrot.lane.b32.xlu0 %v3186_v51, %s2982_s16 }
 0x3af   : > { %724 = vrot.lane.b32.xlu0 %v3176_v49, %s2983_s17 }
 0x3f5   : > { %v2719_v54 = vpop.f32.mrf.mxu1 }
 0x3f6   : > { %v1078_v57 = vmul.f32 0.35355338, %v2719_v54 }
 0x3f7   : > { %v876_v58 = vpop.f32.mrf.mxu1 }
 0x3f8   : > { %v1076_v59 = vmul.f32 0.35355338, %v876_v58  ;;  %v3196_v60 = vadd.f32 %v3193_v56, %v1078_v57 }
 0x3f9   : > { %v2720_v61 = vpop.f32.mrf.mxu1 }
 0x3fa   : > { %v1111_v62 = vsel %vm1104_vm5, %v3196_v60, -inf  ;;  %v3201_v63 = vadd.f32 %v3193_v56, %v1076_v59 }
 0x3fb   : > { %1112 = vmax.xlane.f32.xlu1 %v1111_v62  ;;  %v879_v0 = vpop.f32.mrf.mxu1 }
 0x3fc   : > { %v1077_v1 = vmul.f32 0.35355338, %v879_v0  ;;  %v1105_v2 = vsel %vm1104_vm5, %v3201_v63, -inf }
 0x3fe   : > { %v3206_v3 = vadd.f32 %v3193_v56, %v1077_v1 }
 0x3ff   : > { %1106 = vmax.xlane.f32.xlu1 %v1105_v2 }
 0x400   : > { %v1108_v4 = vsel %vm1104_vm5, %v3206_v3, -inf }
 0x401   : > { %1109 = vmax.xlane.f32.xlu0 %v1108_v4 }
 0x416   : > { %v3210_v5 = vpop.permute.xlu1 %718 }
 0x419   : > { %v3212_v6 = vpop.permute.xlu0 %716 }
 0x41a   : > { %v2616_v7 = vcombine.low %v3212_v6, %v3210_v5  ;;  %v3265_v47 = vpop.permute.xlu1 %722 }
 0x41d   : > { %v3267_v48 = vpop.permute.xlu0 %720 }
 0x421   : > { %v3270_v55 = vpop.permute.xlu0 %724 }
 0x443   : > { %v2725_v8 = vpop.f32.mrf.mxu1  ;;  %v2731_v9 = vpop.f32.mrf.mxu0 }
 0x444   : > { %v1081_v10 = vmul.f32 0.35355338, %v2725_v8  ;;  %v1084_v11 = vmul.f32 0.35355338, %v2731_v9 }
 0x445   : > { %v938_v12 = vpop.f32.mrf.mxu1  ;;  %v1000_v13 = vpop.f32.mrf.mxu0 }
 0x446   : > { %v1079_v14 = vmul.f32 0.35355338, %v938_v12  ;;  %v3217_v15 = vadd.f32 %v3193_v56, %v1084_v11  ;;  %v3220_v16 = vadd.f32 %v3193_v56, %v1081_v10  ;;  %v1082_v19 = vmul.f32 0.35355338, %v1000_v13 }
 0x447   : > { %v2726_v17 = vpop.f32.mrf.mxu1  ;;  %v2732_v18 = vpop.f32.mrf.mxu0 }
 0x448   : > { %v1129_v20 = vsel %vm1104_vm5, %v3217_v15, -inf  ;;  %v1120_v21 = vsel %vm1104_vm5, %v3220_v16, -inf  ;;  %v3227_v22 = vadd.f32 %v3193_v56, %v1079_v14  ;;  %v3235_v30 = vadd.f32 %v3193_v56, %v1082_v19 }
 0x449   : > { %v1003_v23 = vpop.f32.mrf.mxu0  ;;  %1130 = vmax.xlane.f32.xlu1 %v1129_v20  ;;  %1121 = vmax.xlane.f32.xlu0 %v1120_v21  ;;  %v941_v24 = vpop.f32.mrf.mxu1 }
 0x44a   : > { %v1083_v25 = vmul.f32 0.35355338, %v1003_v23  ;;  %v1080_v26 = vmul.f32 0.35355338, %v941_v24  ;;  %v1114_v28 = vsel %vm1104_vm5, %v3227_v22, -inf  ;;  %v1123_v37 = vsel %vm1104_vm5, %v3235_v30, -inf }
 0x44b   : > { %v2737_v27 = vpop.f32.mrf.mxu1 }
 0x44c   : > { %v3232_v29 = vadd.f32 %v3193_v56, %v1080_v26  ;;  %v1087_v32 = vmul.f32 0.35355338, %v2737_v27  ;;  %v3240_v35 = vadd.f32 %v3193_v56, %v1083_v25 }
 0x44d   : > { %1115 = vmax.xlane.f32.xlu1 %v1114_v28  ;;  %v1062_v31 = vpop.f32.mrf.mxu1 }
 0x44e   : > { %v1085_v33 = vmul.f32 0.35355338, %v1062_v31  ;;  %v1117_v34 = vsel %vm1104_vm5, %v3232_v29, -inf  ;;  %v1126_v41 = vsel %vm1104_vm5, %v3240_v35, -inf  ;;  %v3250_v42 = vadd.f32 %v3193_v56, %v1087_v32 }
 0x44f   : > { %1118 = vmax.xlane.f32.xlu0 %v1117_v34  ;;  %v2738_v36 = vpop.f32.mrf.mxu1 }
 0x450   : > { %v3245_v38 = vadd.f32 %v3193_v56, %v1085_v33  ;;  %v1138_v44 = vsel %vm1104_vm5, %v3250_v42, -inf }
 0x451   : > { %1124 = vmax.xlane.f32.xlu1 %v1123_v37  ;;  %v1065_v39 = vpop.f32.mrf.mxu1 }
 0x452   : > { %v1086_v40 = vmul.f32 0.35355338, %v1065_v39  ;;  %v1132_v43 = vsel %vm1104_vm5, %v3245_v38, -inf }
 0x453   : > { %1127 = vmax.xlane.f32.xlu0 %v1126_v41 }
 0x454   : > { %v3257_v45 = vadd.f32 %v3193_v56, %v1086_v40 }
 0x455   : > { %1133 = vmax.xlane.f32.xlu1 %v1132_v43 }
 0x456   : > { %v1135_v46 = vsel %vm1104_vm5, %v3257_v45, -inf }
 0x457   : > { %1139 = vmax.xlane.f32.xlu0 %v1138_v44 }
 0x45b   : > { %1136 = vmax.xlane.f32.xlu0 %v1135_v46 }
 0x466   : > { %728 = vrot.lane.b32.xlu1 %v3180_v50, %s2984_s18 }
 0x471   : > { %730 = vrot.lane.b32.xlu0 %v3176_v49, %s2984_s18 }
 0x484   : > { %v1113_v53 = vpop.xlane.xlu1 %1112 }
 0x485   : > { %v1143_v54 = vsub.f32 %v3196_v60, %v1113_v53 }
 0x487   : > { %v1157_v56 = vmul.f32 1.442695, %v1143_v54 }
 0x488   : > { %v1107_v57 = vpop.xlane.xlu1 %1106 }
 0x489   : > { %2891 = vpow2.f32 %v1157_v56  ;;  %v1141_v58 = vsub.f32 %v3201_v63, %v1107_v57 }
 0x48a   : > { %v1110_v59 = vpop.xlane.xlu0 %1109 }
 0x48b   : > { %v1153_v61 = vmul.f32 1.442695, %v1141_v58  ;;  %v1142_v62 = vsub.f32 %v3206_v3, %v1110_v59  ;;  %v2987_v3 = vmov 0.0  }
 0x48c   : > { %2739 = vmatprep.subr.bf16.mxu0 %v2987_v3  ;;  %2747 = vmatprep.subr.bf16.mxu1 %v2987_v3 }
 0x48d   : > { %2893 = vpow2.f32 %v1153_v61  ;;  %v1155_v0 = vmul.f32 1.442695, %v1142_v62  ;;  %2743 = vmatprep.mubr.msk.bf16.mxu0 %vm2988_vm6, %v2987_v3  ;;  %2751 = vmatprep.mubr.msk.bf16.mxu1 %vm2988_vm6, %v2987_v3 }
 0x48f   : > { %2895 = vpow2.f32 %v1155_v0 }
 0x496   : > { %v3274_v1 = vpop.eup %2891 }
 0x497   : > { %v1183_v2 = vsel %vm1104_vm5, %v3274_v1, 0.0 }
 0x498   : > { %1184 = vadd.xlane.f32.xlu1 %v1183_v2 }
 0x49a   : > { %v3278_v60 = vpop.eup %2893 }
 0x49b   : > { %v1177_v4 = vsel %vm1104_vm5, %v3278_v60, 0.0 }
 0x49c   : > { %v3282_v8 = vpop.eup %2895  ;;  %1178 = vadd.xlane.f32.xlu1 %v1177_v4 }
 0x49d   : > { %v1180_v63 = vsel %vm1104_vm5, %v3282_v8, 0.0 }
 0x49e   : > { %1181 = vadd.xlane.f32.xlu0 %v1180_v63 }
 0x4d2   : > { %v1131_v9 = vpop.xlane.xlu1 %1130  ;;  %v1122_v10 = vpop.xlane.xlu0 %1121 }
 0x4d3   : > { %v1149_v11 = vsub.f32 %v3217_v15, %v1131_v9  ;;  %v1146_v12 = vsub.f32 %v3220_v16, %v1122_v10 }
 0x4d5   : > { %v1169_v13 = vmul.f32 1.442695, %v1149_v11  ;;  %v1163_v14 = vmul.f32 1.442695, %v1146_v12 }
 0x4d6   : > { %v1116_v17 = vpop.xlane.xlu1 %1115 }
 0x4d7   : > { %2897 = vpow2.f32 %v1169_v13  ;;  %v1144_v18 = vsub.f32 %v3227_v22, %v1116_v17 }
 0x4d8   : > { %2899 = vpow2.f32 %v1163_v14  ;;  %v1119_v19 = vpop.xlane.xlu0 %1118 }
 0x4d9   : > { %v1159_v20 = vmul.f32 1.442695, %v1144_v18  ;;  %v1145_v21 = vsub.f32 %v3232_v29, %v1119_v19 }
 0x4da   : > { %v1125_v31 = vpop.xlane.xlu1 %1124 }
 0x4db   : > { %2901 = vpow2.f32 %v1159_v20  ;;  %v1161_v23 = vmul.f32 1.442695, %v1145_v21  ;;  %v1147_v40 = vsub.f32 %v3235_v30, %v1125_v31  ;;  %v2614_v20 = vcombine.low %v3180_v50, %v3176_v49 }
 0x4dc   : > { %v1128_v29 = vpop.xlane.xlu0 %1127  ;;  %v2615_v21 = vcombine.low %v3186_v51, %v3186_v51 }
 0x4dd   : > { %2903 = vpow2.f32 %v1161_v23  ;;  %v1148_v33 = vsub.f32 %v3240_v35, %v1128_v29  ;;  %v1165_v53 = vmul.f32 1.442695, %v1147_v40 }
 0x4de   : > { %v1134_v34 = vpop.xlane.xlu1 %1133 }
 0x4df   : > { %v1167_v37 = vmul.f32 1.442695, %v1148_v33  ;;  %v1150_v39 = vsub.f32 %v3245_v38, %v1134_v34 }
 0x4e0   : > { %v1140_v32 = vpop.xlane.xlu0 %1139 }
 0x4e1   : > { %v1152_v36 = vsub.f32 %v3250_v42, %v1140_v32  ;;  %2905 = vpow2.f32 %v1167_v37  ;;  %v1171_v44 = vmul.f32 1.442695, %v1150_v39 }
 0x4e2   : > { %v729_v56 = vpop.permute.xlu1 %728 }
 0x4e3   : > { %v1175_v41 = vmul.f32 1.442695, %v1152_v36 }
 0x4e4   : > { %v3292_v24 = vpop.eup %2897  ;;  %v1137_v43 = vpop.xlane.xlu0 %1136 }
 0x4e5   : > { %v3294_v25 = vpop.eup %2899  ;;  %v1201_v15 = vsel %vm1104_vm5, %v3292_v24, 0.0  ;;  %v1151_v46 = vsub.f32 %v3257_v45, %v1137_v43  ;;  %2907 = vpow2.f32 %v1175_v41 }
 0x4e6   : > { %1202 = vadd.xlane.f32.xlu1 %v1201_v15  ;;  %v1192_v16 = vsel %vm1104_vm5, %v3294_v25, 0.0  ;;  %2909 = vpow2.f32 %v1171_v44 }
 0x4e7   : > { %1193 = vadd.xlane.f32.xlu0 %v1192_v16  ;;  %v1173_v54 = vmul.f32 1.442695, %v1151_v46  ;;  %2911 = vpow2.f32 %v1165_v53 }
 0x4e8   : > { %v3300_v22 = vpop.eup %2901  ;;  %v731_v59 = vpop.permute.xlu0 %730 }
 0x4e9   : > { %v1186_v26 = vsel %vm1104_vm5, %v3300_v22, 0.0  ;;  %2913 = vpow2.f32 %v1173_v54  ;;  %v2620_v23 = vcombine.low %v729_v56, %v731_v59 }
 0x4ea   : > { %v3304_v27 = vpop.eup %2903 }
 0x4eb   : > { %1187 = vadd.xlane.f32.xlu0 %v1186_v26  ;;  %v1189_v28 = vsel %vm1104_vm5, %v3304_v27, 0.0 }
 0x4ec   : > { %1190 = vadd.xlane.f32.xlu1 %v1189_v28 }
 0x4ee   : > { %v3317_v35 = vpop.eup %2905 }
 0x4ef   : > { %v1198_v30 = vsel %vm1104_vm5, %v3317_v35, 0.0 }
 0x4f2   : > { %v3319_v42 = vpop.eup %2907 }
 0x4f3   : > { %v3323_v38 = vpop.eup %2909  ;;  %v1210_v45 = vsel %vm1104_vm5, %v3319_v42, 0.0 }
 0x4f4   : > { %v3327_v57 = vpop.eup %2911  ;;  %v1204_v61 = vsel %vm1104_vm5, %v3323_v38, 0.0 }
 0x4f5   : > { %v1195_v0 = vsel %vm1104_vm5, %v3327_v57, 0.0 }
 0x4f6   : > { %v3331_v62 = vpop.eup %2913 }
 0x4f7   : > { %v1207_v4 = vsel %vm1104_vm5, %v3331_v62, 0.0 }
 0x4fd   : > { %726 = vrot.lane.b32.xlu1 %v3186_v51, %s2983_s17 }
 0x501   : > { %732 = vrot.lane.b32.xlu0 %v3186_v51, %s2984_s18 }
 0x520   : > { %1199 = vadd.xlane.f32.xlu0 %v1198_v30 }
 0x521   : > { %1211 = vadd.xlane.f32.xlu1 %v1210_v45  ;;  %v1185_v58 = vpop.xlane.xlu1 %1184 }
 0x522   : > { %2915 = vrcp.f32 %v1185_v58 }
 0x524   : > { %1205 = vadd.xlane.f32.xlu0 %v1204_v61 }
 0x525   : > { %1196 = vadd.xlane.f32.xlu1 %v1195_v0  ;;  %v1179_v2 = vpop.xlane.xlu1 %1178 }
 0x526   : > { %2917 = vrcp.f32 %v1179_v2 }
 0x527   : > { %v1182_v63 = vpop.xlane.xlu0 %1181 }
 0x528   : > { %1208 = vadd.xlane.f32.xlu0 %v1207_v4  ;;  %2919 = vrcp.f32 %v1182_v63 }
 0x52f   : > { %v2916_v9 = vpop.eup %2915 }
 0x530   : > { %v1227_v10 = vmul.f32 %v2916_v9, %v3274_v1 }
 0x532   : > { %v1238_v11 = vpack.c.bf16 %v1227_v10, %v1227_v10 }
 0x533   : > { %v2918_v12 = vpop.eup %2917 }
 0x534   : > { %v1344_v13 = vsel %vm1104_vm5, %v1238_v11, 0  ;;  %v1225_v17 = vmul.f32 %v2918_v12, %v3278_v60  ;;  %v2617_v60 = vcombine.low %v3267_v48, %v3267_v48 }
 0x535   : > { %v2920_v14 = vpop.eup %2919  ;;  %2740 = vmatpush3.bf16.xpose.msra.mxu0 %v1344_v13 }
 0x536   : > { %2741 = vmatprep.subr.bf16.mxu0 %v2987_v3  ;;  %v1226_v18 = vmul.f32 %v2920_v14, %v3282_v8  ;;  %v2618_v8 = vcombine.low %v3265_v47, %v3270_v55 }
 0x538   : > { %v1237_v1 = vpack.c.bf16 %v1226_v18, %v1225_v17 }
 0x53a   : > { %v1341_v19 = vsel %vm1104_vm5, %v1237_v1, 0 }
 0x53d   : > { %2742 = vmatpush3.bf16.xpose.msra.mxu0 %v1341_v19 }
 0x53e   : > { %2755 = vmatprep.subr.bf16.mxu0 %v2987_v3 }
 0x552   : > { %1273 = vxpose.xlu1.c.b16.start [1/2] (short) (narrow) %v2614_v20, 16 }
 0x555   : > { %1289 = vxpose.xlu0.c.b16.start [1/2] (short) (narrow) %v2616_v7, 16 }
 0x556   : > { %1274 = vxpose.xlu1.c.b16.end [2/2] (short) (narrow) %v2615_v21, 16 }
 0x559   : > { %1290 = vxpose.xlu0.c.b16.end [2/2] (short) (narrow) %v2617_v60, 16 }
 0x55a   : > { %1305 = vxpose.xlu1.c.b16.start [1/2] (short) (narrow) %v2618_v8, 16 }
 0x55d   : > { %1321 = vxpose.xlu0.c.b16.start [1/2] (short) (narrow) %v2620_v23, 16 }
 0x56f   : > { %v1203_v50 = vpop.xlane.xlu1 %1202 }
 0x570   : > { %v1194_v49 = vpop.xlane.xlu0 %1193 }
 0x571   : > { %2921 = vrcp.f32 %v1194_v49 }
 0x574   : > { %v1188_v15 = vpop.xlane.xlu0 %1187 }
 0x575   : > { %2923 = vrcp.f32 %v1188_v15  ;;  %v1191_v51 = vpop.xlane.xlu1 %1190 }
 0x576   : > { %2925 = vrcp.f32 %v1191_v51 }
 0x577   : > { %2927 = vrcp.f32 %v1203_v50 }
 0x578   : > { %v733_v5 = vpop.permute.xlu0 %732 }
 0x579   : > { %v2621_v6 = vcombine.low %v733_v5, %v733_v5  ;;  %v727_v7 = vpop.permute.xlu1 %726  ;;  %v2989_v5 = vmov 1983009808  }
 0x57a   : > { %v2619_v16 = vcombine.low %v727_v7, %v727_v7 }
 0x57b   : > { %1322 = vxpose.xlu0.c.b16.end [2/2] (short) (narrow) %v2621_v6, 16  ;;  %v1664_v6 = vunpack.c.l.s4 %v2989_v5 }
 0x57c   : > { %1306 = vxpose.xlu1.c.b16.end [2/2] (short) (narrow) %v2619_v16, 16  ;;  %v2990_v16 = vmov 1934713408  }
 0x57e   : > { %v2922_v48 = vpop.eup %2921 }
 0x57f   : > { %v1230_v47 = vmul.f32 %v2922_v48, %v3294_v25  ;;  %v1696_v48 = vunpack.c.l.s4 %v2990_v16 }
 0x581   : > { %v1240_v55 = vpack.c.bf16 %v1230_v47, %v1230_v47 }
 0x582   : > { %v2924_v26 = vpop.eup %2923 }
 0x583   : > { %v2926_v28 = vpop.eup %2925  ;;  %v1393_v29 = vsel %vm1104_vm5, %v1240_v55, 0  ;;  %v1228_v32 = vmul.f32 %v2924_v26, %v3300_v22  ;;  %v1665_v55 = vunpack.c.0.s8 %v1664_v6  ;;  %v1667_v26 = vshrl.u32 %v1088_v52, 7 }
 0x584   : > { %2748 = vmatpush3.bf16.xpose.msra.mxu1 %v1393_v29  ;;  %v1229_v31 = vmul.f32 %v2926_v28, %v3304_v27  ;;  %v2928_v36 = vpop.eup %2927  ;;  %v1697_v28 = vunpack.c.0.s8 %v1696_v48 }
 0x585   : > { %2749 = vmatprep.subr.bf16.mxu1 %v2987_v3  ;;  %v1233_v40 = vmul.f32 %v2928_v36, %v3292_v24  ;;  %v3389_v29 = vsub.s32 %v1665_v55, %v1667_v26 }
 0x586   : > { %v1239_v33 = vpack.c.bf16 %v1229_v31, %v1228_v32 }
 0x587   : > { %v1242_v22 = vpack.c.bf16 %v1233_v40, %v1233_v40 }
 0x588   : > { %v1390_v34 = vsel %vm1104_vm5, %v1239_v33, 0 }
 0x589   : > { %v1442_v44 = vsel %vm1104_vm5, %v1242_v22, 0 }
 0x58c   : > { %2750 = vmatpush3.bf16.xpose.msra.mxu1 %v1390_v34 }
 0x58d   : > { %2763 = vmatprep.subr.bf16.mxu1 %v2987_v3 }
 0x5a9   : > { %v1200_v25 = vpop.xlane.xlu0 %1199 }
 0x5aa   : > { %v1212_v37 = vpop.xlane.xlu1 %1211 }
 0x5ab   : > { %2929 = vrcp.f32 %v1212_v37  ;;  %v3391_v37 = vsub.s32 %v1697_v28, %v1667_v26 }
 0x5ac   : > { %2931 = vrcp.f32 %v1200_v25 }
 0x5ad   : > { %v1206_v39 = vpop.xlane.xlu0 %1205 }
 0x5ae   : > { %v1197_v27 = vpop.xlane.xlu1 %1196 }
 0x5af   : > { %2933 = vrcp.f32 %v1197_v27 }
 0x5b0   : > { %2935 = vrcp.f32 %v1206_v39 }
 0x5b1   : > { %v1209_v41 = vpop.xlane.xlu0 %1208 }
 0x5b2   : > { %2937 = vrcp.f32 %v1209_v41 }
 0x5b4   : > { %v1281_v43 = vpop.trf.xlu1 }
 0x5b5   : > { %2744 = vmatmul.mubr.msk.bf16.vlgmr.msra.gmra.mxu0 %vm1104_vm5, %v1281_v43 }
 0x5b6   : > { %2756 = vmatpush3.bf16.xpose.msra.mxu0 %v1442_v44  ;;  %2759 = vmatprep.mubr.msk.bf16.mxu0 %vm2988_vm6, %v2987_v3 }
 0x5b7   : > { %v1297_v46 = vpop.trf.xlu0  ;;  %2757 = vmatprep.subr.bf16.mxu0 %v2987_v3 }
 0x5b8   : > { %v2930_v53 = vpop.eup %2929  ;;  %2752 = vmatmul.mubr.msk.bf16.vlgmr.msra.gmra.mxu1 %vm1104_vm5, %v1297_v46 }
 0x5b9   : > { %v1236_v24 = vmul.f32 %v2930_v53, %v3319_v42  ;;  %2767 = vmatprep.mubr.msk.bf16.mxu1 %vm2988_vm6, %v2987_v3  ;;  %v2932_v54 = vpop.eup %2931 }
 0x5ba   : > { %v1232_v61 = vmul.f32 %v2932_v54, %v3317_v35 }
 0x5bb   : > { %v1244_v56 = vpack.c.bf16 %v1236_v24, %v1236_v24 }
 0x5bc   : > { %v2934_v30 = vpop.eup %2933 }
 0x5bd   : > { %v2936_v45 = vpop.eup %2935  ;;  %v1491_v58 = vsel %vm1104_vm5, %v1244_v56, 0  ;;  %v1231_v59 = vmul.f32 %v2934_v30, %v3327_v57 }
 0x5be   : > { %2764 = vmatpush3.bf16.xpose.msra.mxu1 %v1491_v58  ;;  %v1234_v42 = vmul.f32 %v2936_v45, %v3323_v38 }
 0x5bf   : > { %v2938_v0 = vpop.eup %2937  ;;  %v1241_v2 = vpack.c.bf16 %v1232_v61, %v1231_v59  ;;  %2765 = vmatprep.subr.bf16.mxu1 %v2987_v3 }
 0x5c0   : > { %v1235_v4 = vmul.f32 %v2938_v0, %v3331_v62 }
 0x5c1   : > { %v1439_v63 = vsel %vm1104_vm5, %v1241_v2, 0 }
 0x5c2   : > { %2758 = vmatpush3.bf16.xpose.msra.mxu0 %v1439_v63  ;;  %v1243_v9 = vpack.c.bf16 %v1235_v4, %v1234_v42 }
 0x5c4   : > { %v1488_v10 = vsel %vm1104_vm5, %v1243_v9, 0 }
 0x5c6   : > { %2766 = vmatpush3.bf16.xpose.msra.mxu1 %v1488_v10 }
 0x5d9   : > { %v1329_v11 = vpop.trf.xlu0 }
 0x5da   : > { %2768 = vmatmul.mubr.msk.bf16.vlgmr.msra.gmra.mxu1 %vm1104_vm5, %v1329_v11  ;;  %v1313_v35 = vpop.trf.xlu1 }
 0x5db   : > { %2760 = vmatmul.mubr.msk.bf16.vlgmr.msra.gmra.mxu0 %vm1104_vm5, %v1313_v35 }
 0x675   : > { %v1380_v57 = vpop.f32.mrf.mxu0 }
 0x676   : > { %1533 = vxpose.xlu1.b32.start.end [1/1] (short) (narrow) %v1380_v57, 24 }
 0x677   : > { %v2745_v3 = vpop.f32.mrf.mxu0 }
 0x678   : > { %v1429_v12 = vpop.f32.mrf.mxu1 }
 0x679   : > { %v1383_v38 = vpop.f32.mrf.mxu0  ;;  %1565 = vxpose.xlu0.b32.start.end [1/1] (short) (narrow) %v1429_v12, 24 }
 0x67a   : > { %v2753_v62 = vpop.f32.mrf.mxu1 }
 0x67b   : > { %v2746_v13 = vpop.f32.mrf.mxu0 }
 0x67c   : > { %v1432_v14 = vpop.f32.mrf.mxu1 }
 0x67e   : > { %v2754_v17 = vpop.f32.mrf.mxu1 }
 0x69a   : > { %v1527_v18 = vpop.f32.mrf.mxu1 }
 0x69b   : > { %1629 = vxpose.xlu1.b32.start.end [1/1] (short) (narrow) %v1527_v18, 24  ;;  %v1478_v1 = vpop.f32.mrf.mxu0 }
 0x69c   : > { %1597 = vxpose.xlu0.b32.start.end [1/1] (short) (narrow) %v1478_v1, 24  ;;  %v2769_v19 = vpop.f32.mrf.mxu1 }
 0x69d   : > { %v2761_v20 = vpop.f32.mrf.mxu0 }
 0x69e   : > { %v1530_v21 = vpop.f32.mrf.mxu1 }
 0x69f   : > { %v1481_v60 = vpop.f32.mrf.mxu0 }
 0x6a0   : > { %v2770_v8 = vpop.f32.mrf.mxu1 }
 0x6a1   : > { %v2762_v23 = vpop.f32.mrf.mxu0 }
 0x6f2   : > { %v1549_v49 = vpop.trf.xlu1 }
 0x6f5   : > { %v1581_v50 = vpop.trf.xlu0 }
 0x6f6   : > { %v1550_v15 = vpop.trf.xlu1 }
 0x6f9   : > { %v1582_v51 = vpop.trf.xlu0 }
 0x6fa   : > { %v3386_v7 = vpop.trf.xlu1 }
 0x6fd   : > { %v1583_v47 = vpop.trf.xlu0 }
 0x717   : > { %v1645_v31 = vpop.trf.xlu1 }
 0x718   : > { %v1677_v32 = vcombine.low %v1581_v50, %v1645_v31  ;;  %v1678_v33 = vcombine.high %v1581_v50, %v1645_v31  ;;  %v1613_v34 = vpop.trf.xlu0 }
 0x719   : > { %v1661_v25 = vcombine.low %v1549_v49, %v1613_v34  ;;  %v1662_v36 = vcombine.high %v1549_v49, %v1613_v34 }
 0x71a   : > { %v1685_v39 = vrot.slane %v1677_v32, %v3389_v29  ;;  %v1692_v40 = vrot.slane %v1678_v33, %v3389_v29 }
 0x71b   : > { %v1669_v27 = vrot.slane %v1661_v25, %v3389_v29  ;;  %v1676_v41 = vrot.slane %v1662_v36, %v3389_v29  ;;  %v1646_v52 = vpop.trf.xlu1 }
 0x71c   : > { %v1745_v22 = vcombine.low %v1582_v51, %v1646_v52  ;;  %v1746_v43 = vcombine.high %v1582_v51, %v1646_v52  ;;  %v1614_v44 = vpop.trf.xlu0 }
 0x71d   : > { %v1693_v46 = vcombine.low %v1669_v27, %v1685_v39  ;;  %v1694_v53 = vcombine.high %v1669_v27, %v1685_v39  ;;  %v1709_v24 = vcombine.low %v1676_v41, %v1692_v40  ;;  %v1710_v54 = vcombine.high %v1676_v41, %v1692_v40 }
 0x71e   : > { %v1753_v56 = vrot.slane %v1745_v22, %v3389_v29  ;;  %v1760_v30 = vrot.slane %v1746_v43, %v3389_v29  ;;  %v1729_v45 = vcombine.low %v1550_v15, %v1614_v44  ;;  %v1730_v58 = vcombine.high %v1550_v15, %v1614_v44 }
 0x71f   : > { %v1701_v59 = vrot.slane %v1693_v46, %v3391_v37  ;;  %v1708_v61 = vrot.slane %v1694_v53, %v3391_v37  ;;  %v1717_v0 = vrot.slane %v1709_v24, %v3391_v37  ;;  %v1724_v2 = vrot.slane %v1710_v54, %v3391_v37  ;;  %v1647_v42 = vpop.trf.xlu1 }
 0x720   : > { %v1737_v4 = vrot.slane %v1729_v45, %v3389_v29  ;;  %v1744_v63 = vrot.slane %v1730_v58, %v3389_v29  ;;  %v1813_v9 = vcombine.low %v1583_v47, %v1647_v42  ;;  %v1814_v10 = vcombine.high %v1583_v47, %v1647_v42  ;;  %v1615_v14 = vpop.trf.xlu0 }
 0x721   : > { %v1865_v11 = vcombine.low %v1701_v59, %v1708_v61  ;;  %v2626_v35 = vcombine.high %v1701_v59, %v1708_v61  ;;  %v1881_v57 = vcombine.low %v1717_v0, %v1724_v2  ;;  %v2627_v3 = vcombine.high %v1717_v0, %v1724_v2 }
 0x722   : > { %v1761_v12 = vcombine.low %v1737_v4, %v1753_v56  ;;  %v1762_v38 = vcombine.high %v1737_v4, %v1753_v56  ;;  %v1777_v62 = vcombine.low %v1744_v63, %v1760_v30  ;;  %v1778_v13 = vcombine.high %v1744_v63, %v1760_v30 }
 0x723   : > { %v1872_v17 = vrot.slane %v1865_v11, %v3389_v29  ;;  %v1880_v18 = vrot.slane %v2626_v35, %v3389_v29  ;;  %v1888_v1 = vrot.slane %v1881_v57, %v3389_v29  ;;  %v1896_v19 = vrot.slane %v2627_v3, %v3389_v29 }
 0x724   : > { %v1769_v20 = vrot.slane %v1761_v12, %v3391_v37  ;;  %v1776_v21 = vrot.slane %v1762_v38, %v3391_v37  ;;  %v1785_v60 = vrot.slane %v1777_v62, %v3391_v37  ;;  %v1792_v8 = vrot.slane %v1778_v13, %v3391_v37  ;;  %v2873_v62 = vld [vmem:[%s3554_s5 + $0x8] sm:$0xff]  }
 0x725   : > { %v1821_v23 = vrot.slane %v1813_v9, %v3389_v29  ;;  %v1828_v49 = vrot.slane %v1814_v10, %v3389_v29  ;;  %v1797_v50 = vcombine.low %v3386_v7, %v1615_v14  ;;  %v1798_v15 = vcombine.high %v3386_v7, %v1615_v14  ;;  %2771 = vmatprep.subr.bf16.mxu0 %v2873_v62 }
 0x726   : > { %v1933_v51 = vcombine.low %v1769_v20, %v1776_v21  ;;  %v2628_v5 = vcombine.high %v1769_v20, %v1776_v21  ;;  %v1949_v6 = vcombine.low %v1785_v60, %v1792_v8  ;;  %v2629_v16 = vcombine.high %v1785_v60, %v1792_v8  ;;  %2772 = vmatpush3.bf16.msra.mxu0 %v2873_v62 }
 0x727   : > { %v1805_v48 = vrot.slane %v1797_v50, %v3389_v29  ;;  %v1812_v47 = vrot.slane %v1798_v15, %v3389_v29  ;;  %v1898_v55 = vcombine.high %v1872_v17, %v1880_v18  ;;  %v1914_v26 = vcombine.high %v1888_v1, %v1896_v19 }
 0x728   : > { %v1940_v28 = vrot.slane %v1933_v51, %v3389_v29  ;;  %v1948_v31 = vrot.slane %v2628_v5, %v3389_v29  ;;  %v1956_v32 = vrot.slane %v1949_v6, %v3389_v29  ;;  %v1964_v33 = vrot.slane %v2629_v16, %v3389_v29 }
 0x729   : > { %v1829_v34 = vcombine.low %v1805_v48, %v1821_v23  ;;  %v1830_v7 = vcombine.high %v1805_v48, %v1821_v23  ;;  %v1845_v25 = vcombine.low %v1812_v47, %v1828_v49  ;;  %v1846_v36 = vcombine.high %v1812_v47, %v1828_v49  ;;  %v2874_v49 = vld [vmem:[%s3554_s5] sm:$0xff]  }
 0x72a   : > { %v3424_v39 = vrot.slane %v1898_v55, %v3391_v37  ;;  %v1928_v40 = vrot.slane %v1914_v26, %v3391_v37  ;;  %v1966_v27 = vcombine.high %v1940_v28, %v1948_v31  ;;  %v1982_v41 = vcombine.high %v1956_v32, %v1964_v33  ;;  %2773 = vmatprep.subr.bf16.mxu0 %v2874_v49 }
 0x72b   : > { %v1837_v52 = vrot.slane %v1829_v34, %v3391_v37  ;;  %v1844_v22 = vrot.slane %v1830_v7, %v3391_v37  ;;  %v1853_v43 = vrot.slane %v1845_v25, %v3391_v37  ;;  %v1860_v44 = vrot.slane %v1846_v36, %v3391_v37  ;;  %2774 = vmatpush3.bf16.msra.mxu0 %v2874_v49 }
 0x72c   : > { %v1931_v46 = vcombine.low %v3424_v39, %v1928_v40  ;;  %v1980_v53 = vrot.slane %v1966_v27, %v3391_v37  ;;  %v1996_v24 = vrot.slane %v1982_v41, %v3391_v37  ;;  %v1897_v54 = vcombine.low %v1872_v17, %v1880_v18 }
 0x72d   : > { %v2001_v56 = vcombine.low %v1837_v52, %v1844_v22  ;;  %v2630_v30 = vcombine.high %v1837_v52, %v1844_v22  ;;  %v2017_v45 = vcombine.low %v1853_v43, %v1860_v44  ;;  %v2631_v58 = vcombine.high %v1853_v43, %v1860_v44 }
 0x72e   : > { %v1999_v59 = vcombine.low %v1980_v53, %v1996_v24  ;;  %v1905_v61 = vrot.slane %v1897_v54, %v3391_v37  ;;  %v1913_v0 = vcombine.low %v1888_v1, %v1896_v19  ;;  %v1965_v2 = vcombine.low %v1940_v28, %v1948_v31  ;;  %v2632_v54 = vld [vmem:[%s3555_s6] ss:$0 sm:$0xff] }
 0x72f   : > { %v1981_v42 = vcombine.low %v1956_v32, %v1964_v33  ;;  %v2008_v4 = vrot.slane %v2001_v56, %v3389_v29  ;;  %v2016_v63 = vrot.slane %v2630_v30, %v3389_v29  ;;  %v2024_v9 = vrot.slane %v2017_v45, %v3389_v29  ;;  %v655_v56 = vld [vmem:[%s3090_s15] sm:$0xff] }
 0x730   : > { %v2855_v10 = vpack.i.bf16 %v1999_v59, %v1931_v46  ;;  %v1921_v11 = vrot.slane %v1913_v0, %v3391_v37  ;;  %v1973_v35 = vrot.slane %v1965_v2, %v3391_v37  ;;  %v2032_v57 = vrot.slane %v2631_v58, %v3389_v29 }
 0x731   : > { %v1989_v3 = vrot.slane %v1981_v42, %v3391_v37  ;;  %v2034_v12 = vcombine.high %v2008_v4, %v2016_v63  ;;  %v2033_v38 = vcombine.low %v2008_v4, %v2016_v63  ;;  %v2000_v5 = vcombine.high %v1980_v53, %v1996_v24  ;;  %v657_v63 = vld [vmem:[%s3090_s15 + $0x10] sm:$0xff] }
 0x732   : > { %2856 = vrot.lane.b32.xlu1 %v2855_v10, %s2991_s22  ;;  %v1929_v13 = vcombine.low %v1905_v61, %v1921_v11  ;;  %v2050_v14 = vcombine.high %v2024_v9, %v2032_v57  ;;  %v2049_v17 = vcombine.low %v2024_v9, %v2032_v57  ;;  %v1930_v18 = vcombine.high %v1905_v61, %v1921_v11  ;;  %v656_v61 = vld [vmem:[%s3090_s15 + $0x8] sm:$0xff] }
 0x733   : > { %v1998_v1 = vcombine.high %v1973_v35, %v1989_v3  ;;  %v1997_v19 = vcombine.low %v1973_v35, %v1989_v3  ;;  %v2041_v20 = vrot.slane %v2033_v38, %v3391_v37  ;;  %v2048_v60 = vrot.slane %v2034_v12, %v3391_v37 }
 0x734   : > { %v2057_v29 = vrot.slane %v2049_v17, %v3391_v37  ;;  %v2064_v8 = vrot.slane %v2050_v14, %v3391_v37  ;;  %v1932_v6 = vcombine.high %v3424_v39, %v1928_v40 }
 0x735   : > { %v2850_v21 = vpack.i.bf16 %v1998_v1, %v1930_v18 }
 0x736   : > { %v2066_v23 = vcombine.high %v2041_v20, %v2057_v29  ;;  %v2065_v50 = vcombine.low %v2041_v20, %v2057_v29  ;;  %v2068_v15 = vcombine.high %v2048_v60, %v2064_v8  ;;  %v2067_v51 = vcombine.low %v2048_v60, %v2064_v8  ;;  %v2875_v8 = vld [vmem:[%s3558_s9 + $0x8] sm:$0xff]  }
 0x737   : > { %2851 = vrot.lane.b32.xlu0 %v2850_v21, %s2992_s30  ;;  %v2860_v37 = vpack.i.bf16 %v2000_v5, %v1932_v6  ;;  %2779 = vmatprep.subr.bf16.mxu1 %v2875_v8 }
 0x738   : > { %2076 = vrot.lane.b32.xlu1 %v2066_v23, %s2992_s30  ;;  %v2876_v23 = vld [vmem:[%s3558_s9] sm:$0xff]   ;;  %2780 = vmatpush3.bf16.msra.mxu1 %v2875_v8 }
 0x739   : > { %2781 = vmatprep.subr.bf16.mxu1 %v2876_v23 }
 0x73b   : > { %2100 = vrot.lane.b32.xlu0 %v2068_v15, %s2993_s14 }
 0x73c   : > { %2088 = vrot.lane.b32.xlu1 %v2067_v51, %s2991_s22  ;;  %2782 = vmatpush3.bf16.msra.mxu1 %v2876_v23 }
 0x740   : > { %2861 = vrot.lane.b32.xlu1 %v2860_v37, %s2993_s14 }
 0x7a4   : > { %v2857_v16 = vpop.permute.xlu1 %2856 }
 0x7a5   : > { %v2859_v31 = vunpack.i.h.bf16 %v2857_v16  ;;  %v2858_v32 = vunpack.i.l.bf16 %v2857_v16 }
 0x7a9   : > { %v2852_v48 = vpop.permute.xlu0 %2851 }
 0x7aa   : > { %v2077_v47 = vpop.permute.xlu1 %2076  ;;  %v2854_v55 = vunpack.i.h.bf16 %v2852_v48  ;;  %v2853_v26 = vunpack.i.l.bf16 %v2852_v48 }
 0x7ab   : > { %v2107_v33 = vsel %vm831_vm2, %v2065_v50, %v2077_v47 }
 0x7ac   : > { %v2106_v34 = vsel %vm831_vm2, %v1997_v19, %v2854_v55  ;;  %v2105_v7 = vsel %vm831_vm2, %v1929_v13, %v2853_v26  ;;  %v2637_v26 = vld [vmem:[%s3556_s7] ss:$0 sm:$0xff] }
 0x7ad   : > { %v2101_v39 = vpop.permute.xlu0 %2100  ;;  %v2109_v41 = vsel %vm2108_vm7, %v2105_v7, %v2858_v32  ;;  %v2110_v52 = vsel %vm2108_vm7, %v2106_v34, %v2859_v31 }
 0x7ae   : > { %v2089_v28 = vpop.permute.xlu1 %2088 }
 0x7af   : > { %v2111_v25 = vsel %vm2108_vm7, %v2107_v33, %v2089_v28  ;;  %v2638_v33 = vld [vmem:[%s3557_s8] ss:$0 sm:$0xff] }
 0x7b0   : > { %v2114_v22 = vsel %vm1104_vm5, %v2111_v25, %v2101_v39 }
 0x7b1   : > { %v2116_v53 = vpack.c.bf16 %v2114_v22, %v2114_v22  ;;  %v2877_v22 = vld [vmem:[%s3560_s11 + $0x38] sm:$0xff]  }
 0x7b2   : > { %v2862_v36 = vpop.permute.xlu1 %2861  ;;  %2787 = vmatprep.subr.bf16.mxu0 %v2877_v22 }
 0x7b3   : > { %v2864_v40 = vunpack.i.h.bf16 %v2862_v36  ;;  %v2863_v27 = vunpack.i.l.bf16 %v2862_v36 }
 0x7b5   : > { %v2112_v43 = vsel %vm1104_vm5, %v2109_v41, %v2863_v27  ;;  %v2113_v44 = vsel %vm1104_vm5, %v2110_v52, %v2864_v40 }
 0x7b6   : > { %v2115_v46 = vpack.c.bf16 %v2113_v44, %v2112_v43  ;;  %v2878_v43 = vld [vmem:[%s3560_s11 + $0x30] sm:$0xff]   ;;  %v2879_v44 = vld [vmem:[%s3560_s11 + $0x28] sm:$0xff]  }
 0x7b8   : > { %2775 = vmatprep.mubr.msk.bf16.mxu0 %vm474_vm0, %v2115_v46  ;;  %v2880_v46 = vld [vmem:[%s3560_s11 + $0x20] sm:$0xff]  }
 0x7b9   : > { %2776 = vmatmul.mubr.msk.bf16.vlgmr.msra.gmra.mxu0 %vm474_vm0, %v2116_v53  ;;  %v2881_v53 = vld [vmem:[%s3560_s11 + $0x18] sm:$0xff]  }
 0x7ba   : > { %2788 = vmatpush3.bf16.msra.mxu0 %v2877_v22 }
 0x7bb   : > { %2789 = vmatprep.subr.bf16.mxu0 %v2878_v43 }
 0x7be   : > { %2790 = vmatpush3.bf16.msra.mxu0 %v2878_v43 }
 0x7bf   : > { %2791 = vmatprep.subr.bf16.mxu0 %v2879_v44 }
 0x7c2   : > { %2792 = vmatpush3.bf16.msra.mxu0 %v2879_v44 }
 0x7c3   : > { %2793 = vmatprep.subr.bf16.mxu0 %v2880_v46 }
 0x7c6   : > { %2794 = vmatpush3.bf16.msra.mxu0 %v2880_v46 }
 0x7c7   : > { %2795 = vmatprep.subr.bf16.mxu0 %v2881_v53 }
 0x7ca   : > { %2796 = vmatpush3.bf16.msra.mxu0 %v2881_v53 }
 0x879   : > { %v2777_v24 = vpop.f32.mrf.mxu0 }
 0x87a   : > { %v2190_v2 = vadd.f32 %v2777_v24, %v2632_v54  ;;  %v2882_v24 = vld [vmem:[%s3560_s11 + $0x10] sm:$0xff]  }
 0x87b   : > { %v2181_v30 = vpop.f32.mrf.mxu0  ;;  %2797 = vmatprep.subr.bf16.mxu0 %v2882_v24 }
 0x87c   : > { %v2182_v45 = vadd.f32 %v2632_v54, %v2181_v30  ;;  %v3473_v10 = vadd.f32 %v2190_v2, %v657_v63  ;;  %2798 = vmatpush3.bf16.msra.mxu0 %v2882_v24  ;;  %v2639_v30 = vld [vmem:[%s3559_s10] ss:$0 sm:$0xff] }
 0x87d   : > { %v2778_v58 = vpop.f32.mrf.mxu0 }
 0x87e   : > { %v3465_v59 = vadd.f32 %v2182_v45, %v655_v56  ;;  %v2206_v35 = vsel %vm474_vm0, %v3473_v10, 0.0  ;;  %v2884_v56 = vld [vmem:[%s3560_s11] sm:$0xff]  }
 0x87f   : > { %v2184_v0 = vpop.f32.mrf.mxu0 }
 0x880   : > { %v2185_v42 = vadd.f32 %v2632_v54, %v2184_v0  ;;  %v2200_v4 = vsel %vm474_vm0, %v3465_v59, 0.0  ;;  %v2883_v54 = vld [vmem:[%s3560_s11 + $0x8] sm:$0xff]  }
 0x881   : > { %2201 = vadd.xlane.f32.xlu1 %v2200_v4  ;;  %2799 = vmatprep.subr.bf16.mxu0 %v2883_v54 }
 0x882   : > { %v3471_v9 = vadd.f32 %v2185_v42, %v656_v61  ;;  %2800 = vmatpush3.bf16.msra.mxu0 %v2883_v54 }
 0x883   : > { %2801 = vmatprep.subr.bf16.mxu0 %v2884_v56 }
 0x884   : > { %v2203_v11 = vsel %vm474_vm0, %v3471_v9, 0.0 }
 0x885   : > { %2204 = vadd.xlane.f32.xlu0 %v2203_v11 }
 0x886   : > { %2802 = vmatpush3.bf16.msra.mxu0 %v2884_v56 }
 0x889   : > { %2207 = vadd.xlane.f32.xlu0 %v2206_v35 }
 0x90a   : > { %v2202_v57 = vpop.xlane.xlu1 %2201 }
 0x90b   : > { %v2210_v3 = vmul.f32 0.03125, %v2202_v57 }
 0x90d   : > { %v2213_v12 = vsub.f32 %v3465_v59, %v2210_v3 }
 0x90e   : > { %v2205_v38 = vpop.xlane.xlu0 %2204 }
 0x90f   : > { %v2211_v62 = vmul.f32 0.03125, %v2205_v38  ;;  %v2216_v13 = vmul.f32 %v2213_v12, %v2213_v12 }
 0x911   : > { %v2214_v14 = vsub.f32 %v3471_v9, %v2211_v62  ;;  %v2219_v17 = vsel %vm474_vm0, %v2216_v13, 0.0 }
 0x912   : > { %v2208_v18 = vpop.xlane.xlu0 %2207  ;;  %2220 = vadd.xlane.f32.xlu0 %v2219_v17 }
 0x913   : > { %v2212_v1 = vmul.f32 0.03125, %v2208_v18  ;;  %v2217_v19 = vmul.f32 %v2214_v14, %v2214_v14 }
 0x915   : > { %v2215_v20 = vsub.f32 %v3473_v10, %v2212_v1  ;;  %v2222_v29 = vsel %vm474_vm0, %v2217_v19, 0.0 }
 0x916   : > { %2223 = vadd.xlane.f32.xlu1 %v2222_v29 }
 0x917   : > { %v2218_v21 = vmul.f32 %v2215_v20, %v2215_v20 }
 0x919   : > { %v2225_v60 = vsel %vm474_vm0, %v2218_v21, 0.0 }
 0x91a   : > { %2226 = vadd.xlane.f32.xlu0 %v2225_v60 }
 0x99b   : > { %v2221_v49 = vpop.xlane.xlu0 %2220 }
 0x99c   : > { %v2228_v50 = vmul.f32 0.03125, %v2221_v49  ;;  %v2647_v49 = vld [vmem:[%s3561_s12] ss:$0 sm:$0xff] }
 0x99e   : > { %v2231_v15 = vadd.f32 1e-05, %v2228_v50 }
 0x99f   : > { %v2224_v51 = vpop.xlane.xlu1 %2223 }
 0x9a0   : > { %2939 = vrsqrt.f32 %v2231_v15  ;;  %v2229_v5 = vmul.f32 0.03125, %v2224_v51 }
 0x9a2   : > { %v2232_v6 = vadd.f32 1e-05, %v2229_v5 }
 0x9a3   : > { %v2227_v37 = vpop.xlane.xlu0 %2226 }
 0x9a4   : > { %2941 = vrsqrt.f32 %v2232_v6  ;;  %v2230_v16 = vmul.f32 0.03125, %v2227_v37 }
 0x9a6   : > { %v2233_v48 = vadd.f32 1e-05, %v2230_v16 }
 0x9a8   : > { %2943 = vrsqrt.f32 %v2233_v48 }
 0x9ad   : > { %v2940_v47 = vpop.eup %2939 }
 0x9ae   : > { %v2237_v55 = vmul.f32 %v2940_v47, %v2213_v12 }
 0x9b0   : > { %v2246_v32 = vmul.f32 %v2637_v26, %v2237_v55 }
 0x9b1   : > { %v2942_v28 = vpop.eup %2941 }
 0x9b2   : > { %v2238_v31 = vmul.f32 %v2942_v28, %v2214_v14  ;;  %v2255_v36 = vadd.f32 %v2638_v33, %v2246_v32 }
 0x9b4   : > { %v2247_v34 = vmul.f32 %v2637_v26, %v2238_v31 }
 0x9b5   : > { %v2944_v7 = vpop.eup %2943 }
 0x9b6   : > { %v2239_v25 = vmul.f32 %v2944_v7, %v2215_v20  ;;  %v2256_v39 = vadd.f32 %v2638_v33, %v2247_v34 }
 0x9b8   : > { %v2258_v40 = vpack.c.bf16 %v2256_v39, %v2255_v36  ;;  %v2248_v27 = vmul.f32 %v2637_v26, %v2239_v25 }
 0x9ba   : > { %2783 = vmatprep.mubr.msk.bf16.mxu1 %vm474_vm0, %v2258_v40  ;;  %v2257_v41 = vadd.f32 %v2638_v33, %v2248_v27 }
 0x9bc   : > { %v2259_v52 = vpack.c.bf16 %v2257_v41, %v2257_v41 }
 0x9be   : > { %2784 = vmatmul.mubr.msk.bf16.vlgmr.msra.gmra.mxu1 %vm474_vm0, %v2259_v52 }
 0xa7e   : > { %v2785_v45 = vpop.f32.mrf.mxu1 }
 0xa7f   : > { %v2332_v58 = vadd.f32 %v2785_v45, %v2639_v30 }
 0xa80   : > { %v2323_v61 = vpop.f32.mrf.mxu1 }
 0xa81   : > { %v2646_v0 = vmul.f32 -1.702, %v2332_v58  ;;  %v2324_v2 = vadd.f32 %v2639_v30, %v2323_v61 }
 0xa82   : > { %v2786_v42 = vpop.f32.mrf.mxu1 }
 0xa83   : > { %v2347_v4 = vmul.f32 1.442695, %v2646_v0  ;;  %v2644_v63 = vmul.f32 -1.702, %v2324_v2 }
 0xa84   : > { %v2326_v11 = vpop.f32.mrf.mxu1 }
 0xa85   : > { %2945 = vpow2.f32 %v2347_v4  ;;  %v2343_v35 = vmul.f32 1.442695, %v2644_v63  ;;  %v2327_v57 = vadd.f32 %v2639_v30, %v2326_v11 }
 0xa87   : > { %2947 = vpow2.f32 %v2343_v35  ;;  %v2645_v3 = vmul.f32 -1.702, %v2327_v57 }
 0xa89   : > { %v2345_v12 = vmul.f32 1.442695, %v2645_v3 }
 0xa8b   : > { %2949 = vpow2.f32 %v2345_v12 }
 0xa92   : > { %v2946_v38 = vpop.eup %2945 }
 0xa93   : > { %v2351_v13 = vadd.f32 1.0, %v2946_v38 }
 0xa94   : > { %v2948_v62 = vpop.eup %2947 }
 0xa95   : > { %v2349_v14 = vadd.f32 1.0, %v2948_v62  ;;  %2951 = vrcp.f32 %v2351_v13 }
 0xa97   : > { %2953 = vrcp.f32 %v2349_v14 }
 0xa98   : > { %v2950_v17 = vpop.eup %2949 }
 0xa99   : > { %v2350_v18 = vadd.f32 1.0, %v2950_v17 }
 0xa9b   : > { %2955 = vrcp.f32 %v2350_v18 }
 0xaa2   : > { %v2952_v1 = vpop.eup %2951 }
 0xaa3   : > { %v2360_v29 = vmul.f32 %v2952_v1, %v2332_v58 }
 0xaa4   : > { %v2954_v19 = vpop.eup %2953 }
 0xaa5   : > { %v2358_v21 = vmul.f32 %v2954_v19, %v2324_v2  ;;  %v2362_v23 = vpack.c.bf16 %v2360_v29, %v2360_v29 }
 0xaa8   : > { %v2956_v20 = vpop.eup %2955 }
 0xaa9   : > { %v2359_v60 = vmul.f32 %v2956_v20, %v2327_v57 }
 0xaab   : > { %v2361_v8 = vpack.c.bf16 %v2359_v60, %v2358_v21 }
 0xaad   : > { %2803 = vmatprep.mubr.bf16.mxu0 %v2361_v8 }
 0xaae   : > { %2804 = vmatmul.mubr.bf16.vlgmr.msra.gmra.mxu0 %v2362_v23 }
 0xb6e   : > { %v2805_v50 = vpop.f32.mrf.mxu0 }
 0xb6f   : > { %v2477_v15 = vadd.f32 %v2805_v50, %v2647_v49 }
 0xb70   : > { %v2468_v51 = vpop.f32.mrf.mxu0 }
 0xb71   : > { %v2484_v5 = vadd.f32 %v2477_v15, %v3473_v10  ;;  %v2469_v6 = vadd.f32 %v2647_v49, %v2468_v51 }
 0xb72   : > { %v2806_v37 = vpop.f32.mrf.mxu0 }
 0xb73   : > { %2487 = vst.msk [vmem:[%s462_s23 + $0x10] sm:$0xff] %vm474_vm0, %v2484_v5  ;;  %v2482_v16 = vadd.f32 %v2469_v6, %v3465_v59 }
 0xb74   : > { %v2471_v48 = vpop.f32.mrf.mxu0 }
 0xb75   : > { %2485 = vst.msk [vmem:[%s462_s23] sm:$0xff] %vm474_vm0, %v2482_v16  ;;  %v2472_v47 = vadd.f32 %v2647_v49, %v2471_v48 }
 0xb77   : > { %v2483_v55 = vadd.f32 %v2472_v47, %v3471_v9 }
 0xb79   : > { %2486 = vst.msk [vmem:[%s462_s23 + $0x8] sm:$0xff] %vm474_vm0, %v2483_v55 }
 0xb7a PF: > { %s23_s27 = sadd.s32 1, %s2979_s27   ;;  %s3563_s25 = smov %s2975_s26 }
 0xb7b   : > { %p20_p5 = scmp.ge.s32.totalorder %s23_s27, 4   ;;  %s3564_s26 = smov %s3566_s28 }
 0xb7d   :  { %22 = sbr.rel (!%p20_p5) target bundleno = 2 (0x2), region = 108 }

</bundles_post_ra>
